<compile_context>
chip_gen: v7x
topology: tpu7x:2x2x1
jax: 0.10.0
libtpu: 0.0.40
codegen_flags: <defaults>
</compile_context>

<pallas_src>
import jax
import jax.numpy as jnp
from jax.experimental import pallas as pl
from jax.experimental.pallas import tpu as pltpu


def _round_up(x, m):
    return ((x + m - 1) // m) * m


def _pick_chunk(T, max_chunk=64):
    """Largest chunk <= max_chunk that divides T (no masked tail steps)."""
    if T <= max_chunk:
        return T
    for c in range(max_chunk, 0, -1):
        if T % c == 0:
            return c
    return T


# -----------------------------------------------------------------------------
# Kernel
#   grid = (batch_tiles, time_chunks)   semantics = ("parallel", "arbitrary")
#   x_ref    : (CHUNK, TILE_B, Dp) bf16   time-major embedding slab
#   wih_ref  : (Dp, 4Dp) bf16             gate cols [i|f|o|g], lane-aligned
#   whh_ref  : (Dp, 4Dp) bf16
#   b_ref    : (1, 4Dp)  f32              b_ih + b_hh
#   wcls_ref : (Dp, Cp)  bf16
#   bcls_ref : (1, Cp)   f32
#   out_ref  : (TILE_B, Cp) f32           logits tile (written at last chunk)
#   h_ref/c_ref : (TILE_B, Dp) f32        recurrent state, persists across chunks
#   g_ref    : (CHUNK*TILE_B, 4Dp) f32    chunk input-projection scratch
# -----------------------------------------------------------------------------
def lstm_classify_kernel(x_ref, wih_ref, whh_ref, b_ref, wcls_ref, bcls_ref,
                         out_ref, h_ref, c_ref, g_ref):
    t = pl.program_id(1)
    n_t = pl.num_programs(1)
    CHUNK, TILE_B, Dp = x_ref.shape

    @pl.when(t == 0)
    def _init():
        h_ref[...] = jnp.zeros_like(h_ref)
        c_ref[...] = jnp.zeros_like(c_ref)

    # ---- chunk input projection: one MXU matmul, bias folded in -------------
    x2d = x_ref[...].reshape(CHUNK * TILE_B, Dp)         # sublane-aligned merge
    g_ref[...] = (jnp.dot(x2d, wih_ref[...],
                          preferred_element_type=jnp.float32)
                  + b_ref[...])                           # (CHUNK*TILE_B, 4Dp) f32

    whh = whh_ref[...]                                    # hoisted bf16 load

    # ---- serial recurrence over this chunk (h/c as vreg loop carries) --------
    def step(s, carry):
        h, c = carry                                      # (TILE_B, Dp) f32
        row0 = pl.multiple_of(s * TILE_B, 8)              # aligned vector loads
        g_x = g_ref[pl.ds(row0, TILE_B), :]
        gates = g_x + jnp.dot(h.astype(whh.dtype), whh,
                              preferred_element_type=jnp.float32)
        # gate order [i, f, o, g]: one sigmoid over 3*Dp lanes, one tanh over Dp
        sig = jax.nn.sigmoid(gates[:, :3 * Dp])
        g_g = jnp.tanh(gates[:, 3 * Dp:])
        i_g = sig[:, 0 * Dp:1 * Dp]
        f_g = sig[:, 1 * Dp:2 * Dp]
        o_g = sig[:, 2 * Dp:3 * Dp]
        c_new = f_g * c + i_g * g_g
        h_new = o_g * jnp.tanh(c_new)
        return h_new, c_new

    # bounded unroll (full unroll explodes code size / vreg live ranges)
    unroll = 8 if CHUNK % 8 == 0 else (4 if CHUNK % 4 == 0 else
                                       (2 if CHUNK % 2 == 0 else 1))
    h, c = jax.lax.fori_loop(0, CHUNK, step, (h_ref[...], c_ref[...]),
                             unroll=unroll)
    h_ref[...] = h
    c_ref[...] = c

    # ---- classifier on the last hidden state (lane-dense output tile) --------
    @pl.when(t == n_t - 1)
    def _finish():
        out_ref[...] = (jnp.dot(h.astype(wcls_ref.dtype), wcls_ref[...],
                                preferred_element_type=jnp.float32)
                        + bcls_ref[...]).astype(out_ref.dtype)


# -----------------------------------------------------------------------------
# Wrapper
# -----------------------------------------------------------------------------
def torch_model_forward(x_ids, params, num_classes):
    """x_ids: (B, T) int32 token ids. Returns logits (B, num_classes)."""
    emb = params["embedding"]                 # (V, Dp) bf16, row 0 zero
    Dp = emb.shape[1]
    Cp = params["w_cls_T"].shape[1]
    G = 4 * Dp
    B, T = x_ids.shape

    TILE_B = 128 if B >= 128 else _round_up(B, 8)
    Bp = _round_up(B, TILE_B)
    nb = Bp // TILE_B
    CHUNK = _pick_chunk(T)
    nt = T // CHUNK

    # glue: gather directly in time-major bf16 (single HBM pass), pad batch
    x_tm = jnp.take(emb, x_ids.T, axis=0)                       # (T, B, Dp) bf16
    x_tm = jnp.pad(x_tm, ((0, 0), (0, Bp - B), (0, 0)))         # (T, Bp, Dp)

    wih, whh = params["w_ih_T"], params["w_hh_T"]
    bias = params["b_lstm"]
    wcls, bcls = params["w_cls_T"], params["b_cls"]

    full = lambda shape: pl.BlockSpec(shape, lambda b, t: tuple(0 for _ in shape))

    # size the scoped-VMEM limit from the actual buffer sum (cap at v7x 64 MiB)
    vmem_bytes = (
        2 * CHUNK * TILE_B * Dp * 2          # x chunk, double-buffered, bf16
        + 2 * Dp * G * 2 * 2                 # w_ih, w_hh bf16
        + 2 * G * 4                          # lstm bias f32
        + 2 * Dp * Cp * 2 + 2 * Cp * 4       # classifier weight + bias
        + 2 * TILE_B * Cp * 4                # output tile
        + CHUNK * TILE_B * G * 4             # gates scratch f32
        + 2 * TILE_B * Dp * 4                # h, c scratch
    )
    vmem_limit = int(min(64 * 1024 * 1024,
                         max(16 * 1024 * 1024, int(vmem_bytes * 1.5))))

    out = pl.pallas_call(
        lstm_classify_kernel,
        out_shape=jax.ShapeDtypeStruct((Bp, Cp), jnp.float32),
        grid=(nb, nt),
        in_specs=[
            pl.BlockSpec((CHUNK, TILE_B, Dp), lambda b, t: (t, b, 0)),
            full((Dp, G)),
            full((Dp, G)),
            full((1, G)),
            full((Dp, Cp)),
            full((1, Cp)),
        ],
        out_specs=pl.BlockSpec((TILE_B, Cp), lambda b, t: (b, 0)),
        scratch_shapes=[
            pltpu.VMEM((TILE_B, Dp), jnp.float32),            # h
            pltpu.VMEM((TILE_B, Dp), jnp.float32),            # c
            pltpu.VMEM((CHUNK * TILE_B, G), jnp.float32),     # chunk gates
        ],
        compiler_params=pltpu.CompilerParams(
            dimension_semantics=("parallel", "arbitrary"),
            vmem_limit_bytes=vmem_limit,
        ),
    )(x_tm, wih, whh, bias, wcls, bcls)
    return out[:B, :num_classes]


# -----------------------------------------------------------------------------
# Parameter preparation (PyTorch layout -> kernel layout)
# -----------------------------------------------------------------------------
def prepare_params(raw):
    """raw: torch-layout f32 params. Repack gates [i,f,g,o]->[i,f,o,g],
    transpose for right-mult, zero-pad hidden dim to 128 lanes, cast to bf16."""
    D = raw["w_hh"].shape[1]
    C = raw["w_cls"].shape[0]
    Dp = _round_up(D, 128)
    Cp = _round_up(C, 128)

    def pack_w(w):  # (4D, D) rows [i,f,g,o] -> (Dp, 4Dp) cols [i,f,o,g], padded
        i, f, g, o = jnp.split(w, 4, axis=0)
        blocks = []
        for blk in (i, f, o, g):
            b = jnp.zeros((Dp, Dp), jnp.float32).at[:D, :D].set(blk.T)
            blocks.append(b)
        return jnp.concatenate(blocks, axis=1).astype(jnp.bfloat16)

    def pack_b(b):  # (4D,) [i,f,g,o] -> (1, 4Dp) [i,f,o,g], padded
        i, f, g, o = jnp.split(b, 4)
        blocks = [jnp.zeros((Dp,), jnp.float32).at[:D].set(blk)
                  for blk in (i, f, o, g)]
        return jnp.concatenate(blocks).reshape(1, 4 * Dp)

    emb = jnp.zeros((raw["embedding"].shape[0], Dp), jnp.bfloat16)
    emb = emb.at[:, :D].set(raw["embedding"].astype(jnp.bfloat16))

    w_cls = jnp.zeros((Dp, Cp), jnp.bfloat16)
    w_cls = w_cls.at[:D, :C].set(raw["w_cls"].T.astype(jnp.bfloat16))
    b_cls = jnp.zeros((1, Cp), jnp.float32).at[0, :C].set(raw["b_cls"])

    return {
        "embedding": emb,                                  # (V, Dp) bf16
        "w_ih_T": pack_w(raw["w_ih"]),                     # (Dp, 4Dp) bf16
        "w_hh_T": pack_w(raw["w_hh"]),                     # (Dp, 4Dp) bf16
        "b_lstm": pack_b(raw["b_ih"] + raw["b_hh"]),       # (1, 4Dp) f32
        "w_cls_T": w_cls,                                  # (Dp, Cp) bf16
        "b_cls": b_cls,                                    # (1, Cp) f32
    }


def init_params(key, vocab_size, vector_dim, sentence_length):
    """Raw parameters in PyTorch layout (gate row-blocks [i, f, g, o])."""
    ks = jax.random.split(key, 7)
    D = vector_dim
    emb = jax.random.normal(ks[0], (vocab_size, D), jnp.float32) * 0.1
    emb = emb.at[0].set(0.0)                               # padding_idx=0
    w_ih = jax.random.normal(ks[1], (4 * D, D), jnp.float32) * 0.1
    w_hh = jax.random.normal(ks[2], (4 * D, D), jnp.float32) * 0.1
    b_ih = jax.random.normal(ks[3], (4 * D,), jnp.float32) * 0.1
    b_hh = jax.random.normal(ks[4], (4 * D,), jnp.float32) * 0.1
    w_cls = jax.random.normal(ks[5], (sentence_length, D), jnp.float32) * 0.1
    b_cls = jax.random.normal(ks[6], (sentence_length,), jnp.float32) * 0.1
    return dict(embedding=emb, w_ih=w_ih, w_hh=w_hh, b_ih=b_ih, b_hh=b_hh,
                w_cls=w_cls, b_cls=b_cls)


def reference_forward(x_ids, raw):
    """Pure-JAX f32 reference matching PyTorch nn.LSTM semantics."""
    D = raw["w_hh"].shape[1]
    x = jnp.take(raw["embedding"], x_ids, axis=0)          # (B, T, D) f32
    w_ih, w_hh = raw["w_ih"], raw["w_hh"]
    b = raw["b_ih"] + raw["b_hh"]

    def cell(carry, x_t):
        h, c = carry
        g = x_t @ w_ih.T + h @ w_hh.T + b
        i = jax.nn.sigmoid(g[:, 0 * D:1 * D])
        f = jax.nn.sigmoid(g[:, 1 * D:2 * D])
        gg = jnp.tanh(g[:, 2 * D:3 * D])
        o = jax.nn.sigmoid(g[:, 3 * D:4 * D])
        c = f * c + i * gg
        h = o * jnp.tanh(c)
        return (h, c), None

    B = x.shape[0]
    init = (jnp.zeros((B, D), jnp.float32), jnp.zeros((B, D), jnp.float32))
    (h_T, _), _ = jax.lax.scan(cell, init, jnp.transpose(x, (1, 0, 2)))
    return h_T @ raw["w_cls"].T + raw["b_cls"]


# TODO(synk): training-path cross_entropy loss (y is not None branch) is left
# to standard JAX (optax.softmax_cross_entropy); only the y_pred path is a kernel.

if __name__ == "__main__":
    vector_dim = 32
    sentence_length = 8
    vocab_size = 30
    batch = 2

    key = jax.random.PRNGKey(0)
    k_param, k_x = jax.random.split(key)
    raw = init_params(k_param, vocab_size, vector_dim, sentence_length)
    params = prepare_params(raw)
    x_ids = jax.random.randint(k_x, (batch, sentence_length), 0, vocab_size,
                               dtype=jnp.int32)

    y_pred = torch_model_forward(x_ids, params, num_classes=sentence_length)
    jax.block_until_ready(y_pred)
    assert y_pred.shape == (batch, sentence_length)

    # correctness vs pure-f32 reference (bf16 matmul path tolerance)
    y_ref = reference_forward(x_ids, raw)
    max_err = float(jnp.max(jnp.abs(y_pred - y_ref)))
    assert jnp.allclose(y_pred, y_ref, atol=2e-2, rtol=2e-2), max_err

    print("KERNEL_OK")
</pallas_src>

<mosaic_0001>
module attributes {stable_mosaic.version = 11 : i64} {
  func.func @lstm_classify_kernel(%arg0: i32, %arg1: i32, %arg2: memref<8x8x128xbf16, #tpu.memory_space<vmem>>, %arg3: memref<128x512xbf16, #tpu.memory_space<vmem>>, %arg4: memref<128x512xbf16, #tpu.memory_space<vmem>>, %arg5: memref<1x512xf32, #tpu.memory_space<vmem>>, %arg6: memref<128x128xbf16, #tpu.memory_space<vmem>>, %arg7: memref<1x128xf32, #tpu.memory_space<vmem>>, %arg8: memref<8x128xf32, #tpu.memory_space<vmem>>, %arg9: memref<8x128xf32, #tpu.memory_space<vmem>>, %arg10: memref<8x128xf32, #tpu.memory_space<vmem>>, %arg11: memref<64x512xf32, #tpu.memory_space<vmem>>) attributes {dimension_semantics = [#tpu.dimension_semantics<parallel>, #tpu.dimension_semantics<arbitrary>], iteration_bounds = array<i64: 1, 1>, scalar_prefetch = 0 : i64, scratch_operands = 3 : i64, tpu.core_type = #tpu.core_type<tc>, window_params = [{transform_indices = @transform_0, window_bounds = array<i64: 8, 8, 128>}, {pipeline_mode = #tpu.pipeline_mode<synchronous>, transform_indices = @transform_1, window_bounds = array<i64: 128, 512>}, {pipeline_mode = #tpu.pipeline_mode<synchronous>, transform_indices = @transform_2, window_bounds = array<i64: 128, 512>}, {pipeline_mode = #tpu.pipeline_mode<synchronous>, transform_indices = @transform_3, window_bounds = array<i64: 1, 512>}, {pipeline_mode = #tpu.pipeline_mode<synchronous>, transform_indices = @transform_4, window_bounds = array<i64: 128, 128>}, {pipeline_mode = #tpu.pipeline_mode<synchronous>, transform_indices = @transform_5, window_bounds = array<i64: 1, 128>}, {transform_indices = @transform_6, window_bounds = array<i64: 8, 128>}]} {
    %c0_i32 = arith.constant 0 : i32
    %0 = arith.cmpi eq, %arg1, %c0_i32 : i32
    %1 = arith.extui %0 : i1 to i32
    %c0_i32_0 = arith.constant 0 : i32
    %2 = arith.cmpi ne, %1, %c0_i32_0 : i32
    scf.if %2 {
      %cst_54 = arith.constant 0.000000e+00 : f32
      %203 = vector.broadcast %cst_54 : f32 to vector<8x128xf32>
      %c0_55 = arith.constant 0 : index
      %c0_56 = arith.constant 0 : index
      %204 = vector.load %arg9[%c0_55, %c0_56] : memref<8x128xf32, #tpu.memory_space<vmem>>, vector<8x128xf32>
      tpu.vector_store %arg9[%c0_55, %c0_56], %203 {strides = array<i32>} : memref<8x128xf32, #tpu.memory_space<vmem>>, vector<8x128xf32>,
      %cst_57 = arith.constant 0.000000e+00 : f32
      %205 = vector.broadcast %cst_57 : f32 to vector<8x128xf32>
      %c0_58 = arith.constant 0 : index
      %c0_59 = arith.constant 0 : index
      %206 = vector.load %arg10[%c0_58, %c0_59] : memref<8x128xf32, #tpu.memory_space<vmem>>, vector<8x128xf32>
      tpu.vector_store %arg10[%c0_58, %c0_59], %205 {strides = array<i32>} : memref<8x128xf32, #tpu.memory_space<vmem>>, vector<8x128xf32>,
    } else {
    }
    %c0 = arith.constant 0 : index
    %c0_1 = arith.constant 0 : index
    %c0_2 = arith.constant 0 : index
    %3 = vector.load %arg2[%c0, %c0_1, %c0_2] : memref<8x8x128xbf16, #tpu.memory_space<vmem>>, vector<8x8x128xbf16>
    %4 = vector.shape_cast %3 : vector<8x8x128xbf16> to vector<64x128xbf16>
    %c0_3 = arith.constant 0 : index
    %c0_4 = arith.constant 0 : index
    %5 = vector.load %arg3[%c0_3, %c0_4] : memref<128x512xbf16, #tpu.memory_space<vmem>>, vector<128x512xbf16>
    %cst = arith.constant dense<0.000000e+00> : vector<64x512xf32>
    %6 = tpu.matmul %4, %5, %cst {dimension_numbers = #tpu.dot_dimension_numbers<[1], [0], [0], [1], [0, 0, 1, 1], [], []>} : vector<64x128xbf16>, vector<128x512xbf16>, vector<64x512xf32> -> vector<64x512xf32>
    %c0_5 = arith.constant 0 : index
    %c0_6 = arith.constant 0 : index
    %7 = vector.load %arg5[%c0_5, %c0_6] : memref<1x512xf32, #tpu.memory_space<vmem>>, vector<1x512xf32>
    %8 = vector.broadcast %7 : vector<1x512xf32> to vector<64x512xf32>
    %9 = arith.addf %6, %8 : vector<64x512xf32>
    %c0_7 = arith.constant 0 : index
    %c0_8 = arith.constant 0 : index
    %10 = vector.load %arg11[%c0_7, %c0_8] : memref<64x512xf32, #tpu.memory_space<vmem>>, vector<64x512xf32>
    tpu.vector_store %arg11[%c0_7, %c0_8], %9 {strides = array<i32>} : memref<64x512xf32, #tpu.memory_space<vmem>>, vector<64x512xf32>,
    %c0_9 = arith.constant 0 : index
    %c0_10 = arith.constant 0 : index
    %11 = vector.load %arg4[%c0_9, %c0_10] : memref<128x512xbf16, #tpu.memory_space<vmem>>, vector<128x512xbf16>
    %c0_11 = arith.constant 0 : index
    %c0_12 = arith.constant 0 : index
    %12 = vector.load %arg9[%c0_11, %c0_12] : memref<8x128xf32, #tpu.memory_space<vmem>>, vector<8x128xf32>
    %c0_13 = arith.constant 0 : index
    %c0_14 = arith.constant 0 : index
    %13 = vector.load %arg10[%c0_13, %c0_14] : memref<8x128xf32, #tpu.memory_space<vmem>>, vector<8x128xf32>
    %c0_i32_15 = arith.constant 0 : i32
    %c8_i32 = arith.constant 8 : i32
    %14 = arith.muli %c0_i32_15, %c8_i32 : i32
    %15 = tpu.assume_multiple %14, 8 : i32
    %16 = arith.index_cast %15 : i32 to index
    %c0_16 = arith.constant 0 : index
    %17 = vector.load %arg11[%16, %c0_16] : memref<64x512xf32, #tpu.memory_space<vmem>>, vector<8x512xf32>
    %18 = arith.truncf %12 : vector<8x128xf32> to vector<8x128xbf16>
    %cst_17 = arith.constant dense<0.000000e+00> : vector<8x512xf32>
    %19 = tpu.matmul %18, %11, %cst_17 {dimension_numbers = #tpu.dot_dimension_numbers<[1], [0], [0], [1], [0, 0, 1, 1], [], []>} : vector<8x128xbf16>, vector<128x512xbf16>, vector<8x512xf32> -> vector<8x512xf32>
    %20 = arith.addf %17, %19 : vector<8x512xf32>
    %21 = vector.extract_strided_slice %20 {offsets = [0, 0], sizes = [8, 384], strides = [1, 1]} : vector<8x512xf32> to vector<8x384xf32>
    %22 = arith.negf %21 : vector<8x384xf32>
    %23 = math.exp %22 : vector<8x384xf32>
    %cst_18 = arith.constant 1.000000e+00 : f32
    %24 = vector.broadcast %cst_18 : f32 to vector<8x384xf32>
    %25 = arith.addf %24, %23 : vector<8x384xf32>
    %26 = arith.divf %24, %25 : vector<8x384xf32>
    %27 = vector.extract_strided_slice %20 {offsets = [0, 384], sizes = [8, 128], strides = [1, 1]} : vector<8x512xf32> to vector<8x128xf32>
    %28 = math.tanh %27 : vector<8x128xf32>
    %29 = vector.extract_strided_slice %26 {offsets = [0, 0], sizes = [8, 128], strides = [1, 1]} : vector<8x384xf32> to vector<8x128xf32>
    %30 = vector.extract_strided_slice %26 {offsets = [0, 128], sizes = [8, 128], strides = [1, 1]} : vector<8x384xf32> to vector<8x128xf32>
    %31 = vector.extract_strided_slice %26 {offsets = [0, 256], sizes = [8, 128], strides = [1, 1]} : vector<8x384xf32> to vector<8x128xf32>
    %32 = arith.mulf %30, %13 : vector<8x128xf32>
    %33 = arith.mulf %29, %28 : vector<8x128xf32>
    %34 = arith.addf %32, %33 : vector<8x128xf32>
    %35 = math.tanh %34 : vector<8x128xf32>
    %36 = arith.mulf %31, %35 : vector<8x128xf32>
    %c1_i32 = arith.constant 1 : i32
    %c8_i32_19 = arith.constant 8 : i32
    %37 = arith.muli %c1_i32, %c8_i32_19 : i32
    %38 = tpu.assume_multiple %37, 8 : i32
    %39 = arith.index_cast %38 : i32 to index
    %c0_20 = arith.constant 0 : index
    %40 = vector.load %arg11[%39, %c0_20] : memref<64x512xf32, #tpu.memory_space<vmem>>, vector<8x512xf32>
    %41 = arith.truncf %36 : vector<8x128xf32> to vector<8x128xbf16>
    %cst_21 = arith.constant dense<0.000000e+00> : vector<8x512xf32>
    %42 = tpu.matmul %41, %11, %cst_21 {dimension_numbers = #tpu.dot_dimension_numbers<[1], [0], [0], [1], [0, 0, 1, 1], [], []>} : vector<8x128xbf16>, vector<128x512xbf16>, vector<8x512xf32> -> vector<8x512xf32>
    %43 = arith.addf %40, %42 : vector<8x512xf32>
    %44 = vector.extract_strided_slice %43 {offsets = [0, 0], sizes = [8, 384], strides = [1, 1]} : vector<8x512xf32> to vector<8x384xf32>
    %45 = arith.negf %44 : vector<8x384xf32>
    %46 = math.exp %45 : vector<8x384xf32>
    %cst_22 = arith.constant 1.000000e+00 : f32
    %47 = vector.broadcast %cst_22 : f32 to vector<8x384xf32>
    %48 = arith.addf %47, %46 : vector<8x384xf32>
    %49 = arith.divf %47, %48 : vector<8x384xf32>
    %50 = vector.extract_strided_slice %43 {offsets = [0, 384], sizes = [8, 128], strides = [1, 1]} : vector<8x512xf32> to vector<8x128xf32>
    %51 = math.tanh %50 : vector<8x128xf32>
    %52 = vector.extract_strided_slice %49 {offsets = [0, 0], sizes = [8, 128], strides = [1, 1]} : vector<8x384xf32> to vector<8x128xf32>
    %53 = vector.extract_strided_slice %49 {offsets = [0, 128], sizes = [8, 128], strides = [1, 1]} : vector<8x384xf32> to vector<8x128xf32>
    %54 = vector.extract_strided_slice %49 {offsets = [0, 256], sizes = [8, 128], strides = [1, 1]} : vector<8x384xf32> to vector<8x128xf32>
    %55 = arith.mulf %53, %34 : vector<8x128xf32>
    %56 = arith.mulf %52, %51 : vector<8x128xf32>
    %57 = arith.addf %55, %56 : vector<8x128xf32>
    %58 = math.tanh %57 : vector<8x128xf32>
    %59 = arith.mulf %54, %58 : vector<8x128xf32>
    %c2_i32 = arith.constant 2 : i32
    %c8_i32_23 = arith.constant 8 : i32
    %60 = arith.muli %c2_i32, %c8_i32_23 : i32
    %61 = tpu.assume_multiple %60, 8 : i32
    %62 = arith.index_cast %61 : i32 to index
    %c0_24 = arith.constant 0 : index
    %63 = vector.load %arg11[%62, %c0_24] : memref<64x512xf32, #tpu.memory_space<vmem>>, vector<8x512xf32>
    %64 = arith.truncf %59 : vector<8x128xf32> to vector<8x128xbf16>
    %cst_25 = arith.constant dense<0.000000e+00> : vector<8x512xf32>
    %65 = tpu.matmul %64, %11, %cst_25 {dimension_numbers = #tpu.dot_dimension_numbers<[1], [0], [0], [1], [0, 0, 1, 1], [], []>} : vector<8x128xbf16>, vector<128x512xbf16>, vector<8x512xf32> -> vector<8x512xf32>
    %66 = arith.addf %63, %65 : vector<8x512xf32>
    %67 = vector.extract_strided_slice %66 {offsets = [0, 0], sizes = [8, 384], strides = [1, 1]} : vector<8x512xf32> to vector<8x384xf32>
    %68 = arith.negf %67 : vector<8x384xf32>
    %69 = math.exp %68 : vector<8x384xf32>
    %cst_26 = arith.constant 1.000000e+00 : f32
    %70 = vector.broadcast %cst_26 : f32 to vector<8x384xf32>
    %71 = arith.addf %70, %69 : vector<8x384xf32>
    %72 = arith.divf %70, %71 : vector<8x384xf32>
    %73 = vector.extract_strided_slice %66 {offsets = [0, 384], sizes = [8, 128], strides = [1, 1]} : vector<8x512xf32> to vector<8x128xf32>
    %74 = math.tanh %73 : vector<8x128xf32>
    %75 = vector.extract_strided_slice %72 {offsets = [0, 0], sizes = [8, 128], strides = [1, 1]} : vector<8x384xf32> to vector<8x128xf32>
    %76 = vector.extract_strided_slice %72 {offsets = [0, 128], sizes = [8, 128], strides = [1, 1]} : vector<8x384xf32> to vector<8x128xf32>
    %77 = vector.extract_strided_slice %72 {offsets = [0, 256], sizes = [8, 128], strides = [1, 1]} : vector<8x384xf32> to vector<8x128xf32>
    %78 = arith.mulf %76, %57 : vector<8x128xf32>
    %79 = arith.mulf %75, %74 : vector<8x128xf32>
    %80 = arith.addf %78, %79 : vector<8x128xf32>
    %81 = math.tanh %80 : vector<8x128xf32>
    %82 = arith.mulf %77, %81 : vector<8x128xf32>
    %c3_i32 = arith.constant 3 : i32
    %c8_i32_27 = arith.constant 8 : i32
    %83 = arith.muli %c3_i32, %c8_i32_27 : i32
    %84 = tpu.assume_multiple %83, 8 : i32
    %85 = arith.index_cast %84 : i32 to index
    %c0_28 = arith.constant 0 : index
    %86 = vector.load %arg11[%85, %c0_28] : memref<64x512xf32, #tpu.memory_space<vmem>>, vector<8x512xf32>
    %87 = arith.truncf %82 : vector<8x128xf32> to vector<8x128xbf16>
    %cst_29 = arith.constant dense<0.000000e+00> : vector<8x512xf32>
    %88 = tpu.matmul %87, %11, %cst_29 {dimension_numbers = #tpu.dot_dimension_numbers<[1], [0], [0], [1], [0, 0, 1, 1], [], []>} : vector<8x128xbf16>, vector<128x512xbf16>, vector<8x512xf32> -> vector<8x512xf32>
    %89 = arith.addf %86, %88 : vector<8x512xf32>
    %90 = vector.extract_strided_slice %89 {offsets = [0, 0], sizes = [8, 384], strides = [1, 1]} : vector<8x512xf32> to vector<8x384xf32>
    %91 = arith.negf %90 : vector<8x384xf32>
    %92 = math.exp %91 : vector<8x384xf32>
    %cst_30 = arith.constant 1.000000e+00 : f32
    %93 = vector.broadcast %cst_30 : f32 to vector<8x384xf32>
    %94 = arith.addf %93, %92 : vector<8x384xf32>
    %95 = arith.divf %93, %94 : vector<8x384xf32>
    %96 = vector.extract_strided_slice %89 {offsets = [0, 384], sizes = [8, 128], strides = [1, 1]} : vector<8x512xf32> to vector<8x128xf32>
    %97 = math.tanh %96 : vector<8x128xf32>
    %98 = vector.extract_strided_slice %95 {offsets = [0, 0], sizes = [8, 128], strides = [1, 1]} : vector<8x384xf32> to vector<8x128xf32>
    %99 = vector.extract_strided_slice %95 {offsets = [0, 128], sizes = [8, 128], strides = [1, 1]} : vector<8x384xf32> to vector<8x128xf32>
    %100 = vector.extract_strided_slice %95 {offsets = [0, 256], sizes = [8, 128], strides = [1, 1]} : vector<8x384xf32> to vector<8x128xf32>
    %101 = arith.mulf %99, %80 : vector<8x128xf32>
    %102 = arith.mulf %98, %97 : vector<8x128xf32>
    %103 = arith.addf %101, %102 : vector<8x128xf32>
    %104 = math.tanh %103 : vector<8x128xf32>
    %105 = arith.mulf %100, %104 : vector<8x128xf32>
    %c4_i32 = arith.constant 4 : i32
    %c8_i32_31 = arith.constant 8 : i32
    %106 = arith.muli %c4_i32, %c8_i32_31 : i32
    %107 = tpu.assume_multiple %106, 8 : i32
    %108 = arith.index_cast %107 : i32 to index
    %c0_32 = arith.constant 0 : index
    %109 = vector.load %arg11[%108, %c0_32] : memref<64x512xf32, #tpu.memory_space<vmem>>, vector<8x512xf32>
    %110 = arith.truncf %105 : vector<8x128xf32> to vector<8x128xbf16>
    %cst_33 = arith.constant dense<0.000000e+00> : vector<8x512xf32>
    %111 = tpu.matmul %110, %11, %cst_33 {dimension_numbers = #tpu.dot_dimension_numbers<[1], [0], [0], [1], [0, 0, 1, 1], [], []>} : vector<8x128xbf16>, vector<128x512xbf16>, vector<8x512xf32> -> vector<8x512xf32>
    %112 = arith.addf %109, %111 : vector<8x512xf32>
    %113 = vector.extract_strided_slice %112 {offsets = [0, 0], sizes = [8, 384], strides = [1, 1]} : vector<8x512xf32> to vector<8x384xf32>
    %114 = arith.negf %113 : vector<8x384xf32>
    %115 = math.exp %114 : vector<8x384xf32>
    %cst_34 = arith.constant 1.000000e+00 : f32
    %116 = vector.broadcast %cst_34 : f32 to vector<8x384xf32>
    %117 = arith.addf %116, %115 : vector<8x384xf32>
    %118 = arith.divf %116, %117 : vector<8x384xf32>
    %119 = vector.extract_strided_slice %112 {offsets = [0, 384], sizes = [8, 128], strides = [1, 1]} : vector<8x512xf32> to vector<8x128xf32>
    %120 = math.tanh %119 : vector<8x128xf32>
    %121 = vector.extract_strided_slice %118 {offsets = [0, 0], sizes = [8, 128], strides = [1, 1]} : vector<8x384xf32> to vector<8x128xf32>
    %122 = vector.extract_strided_slice %118 {offsets = [0, 128], sizes = [8, 128], strides = [1, 1]} : vector<8x384xf32> to vector<8x128xf32>
    %123 = vector.extract_strided_slice %118 {offsets = [0, 256], sizes = [8, 128], strides = [1, 1]} : vector<8x384xf32> to vector<8x128xf32>
    %124 = arith.mulf %122, %103 : vector<8x128xf32>
    %125 = arith.mulf %121, %120 : vector<8x128xf32>
    %126 = arith.addf %124, %125 : vector<8x128xf32>
    %127 = math.tanh %126 : vector<8x128xf32>
    %128 = arith.mulf %123, %127 : vector<8x128xf32>
    %c5_i32 = arith.constant 5 : i32
    %c8_i32_35 = arith.constant 8 : i32
    %129 = arith.muli %c5_i32, %c8_i32_35 : i32
    %130 = tpu.assume_multiple %129, 8 : i32
    %131 = arith.index_cast %130 : i32 to index
    %c0_36 = arith.constant 0 : index
    %132 = vector.load %arg11[%131, %c0_36] : memref<64x512xf32, #tpu.memory_space<vmem>>, vector<8x512xf32>
    %133 = arith.truncf %128 : vector<8x128xf32> to vector<8x128xbf16>
    %cst_37 = arith.constant dense<0.000000e+00> : vector<8x512xf32>
    %134 = tpu.matmul %133, %11, %cst_37 {dimension_numbers = #tpu.dot_dimension_numbers<[1], [0], [0], [1], [0, 0, 1, 1], [], []>} : vector<8x128xbf16>, vector<128x512xbf16>, vector<8x512xf32> -> vector<8x512xf32>
    %135 = arith.addf %132, %134 : vector<8x512xf32>
    %136 = vector.extract_strided_slice %135 {offsets = [0, 0], sizes = [8, 384], strides = [1, 1]} : vector<8x512xf32> to vector<8x384xf32>
    %137 = arith.negf %136 : vector<8x384xf32>
    %138 = math.exp %137 : vector<8x384xf32>
    %cst_38 = arith.constant 1.000000e+00 : f32
    %139 = vector.broadcast %cst_38 : f32 to vector<8x384xf32>
    %140 = arith.addf %139, %138 : vector<8x384xf32>
    %141 = arith.divf %139, %140 : vector<8x384xf32>
    %142 = vector.extract_strided_slice %135 {offsets = [0, 384], sizes = [8, 128], strides = [1, 1]} : vector<8x512xf32> to vector<8x128xf32>
    %143 = math.tanh %142 : vector<8x128xf32>
    %144 = vector.extract_strided_slice %141 {offsets = [0, 0], sizes = [8, 128], strides = [1, 1]} : vector<8x384xf32> to vector<8x128xf32>
    %145 = vector.extract_strided_slice %141 {offsets = [0, 128], sizes = [8, 128], strides = [1, 1]} : vector<8x384xf32> to vector<8x128xf32>
    %146 = vector.extract_strided_slice %141 {offsets = [0, 256], sizes = [8, 128], strides = [1, 1]} : vector<8x384xf32> to vector<8x128xf32>
    %147 = arith.mulf %145, %126 : vector<8x128xf32>
    %148 = arith.mulf %144, %143 : vector<8x128xf32>
    %149 = arith.addf %147, %148 : vector<8x128xf32>
    %150 = math.tanh %149 : vector<8x128xf32>
    %151 = arith.mulf %146, %150 : vector<8x128xf32>
    %c6_i32 = arith.constant 6 : i32
    %c8_i32_39 = arith.constant 8 : i32
    %152 = arith.muli %c6_i32, %c8_i32_39 : i32
    %153 = tpu.assume_multiple %152, 8 : i32
    %154 = arith.index_cast %153 : i32 to index
    %c0_40 = arith.constant 0 : index
    %155 = vector.load %arg11[%154, %c0_40] : memref<64x512xf32, #tpu.memory_space<vmem>>, vector<8x512xf32>
    %156 = arith.truncf %151 : vector<8x128xf32> to vector<8x128xbf16>
    %cst_41 = arith.constant dense<0.000000e+00> : vector<8x512xf32>
    %157 = tpu.matmul %156, %11, %cst_41 {dimension_numbers = #tpu.dot_dimension_numbers<[1], [0], [0], [1], [0, 0, 1, 1], [], []>} : vector<8x128xbf16>, vector<128x512xbf16>, vector<8x512xf32> -> vector<8x512xf32>
    %158 = arith.addf %155, %157 : vector<8x512xf32>
    %159 = vector.extract_strided_slice %158 {offsets = [0, 0], sizes = [8, 384], strides = [1, 1]} : vector<8x512xf32> to vector<8x384xf32>
    %160 = arith.negf %159 : vector<8x384xf32>
    %161 = math.exp %160 : vector<8x384xf32>
    %cst_42 = arith.constant 1.000000e+00 : f32
    %162 = vector.broadcast %cst_42 : f32 to vector<8x384xf32>
    %163 = arith.addf %162, %161 : vector<8x384xf32>
    %164 = arith.divf %162, %163 : vector<8x384xf32>
    %165 = vector.extract_strided_slice %158 {offsets = [0, 384], sizes = [8, 128], strides = [1, 1]} : vector<8x512xf32> to vector<8x128xf32>
    %166 = math.tanh %165 : vector<8x128xf32>
    %167 = vector.extract_strided_slice %164 {offsets = [0, 0], sizes = [8, 128], strides = [1, 1]} : vector<8x384xf32> to vector<8x128xf32>
    %168 = vector.extract_strided_slice %164 {offsets = [0, 128], sizes = [8, 128], strides = [1, 1]} : vector<8x384xf32> to vector<8x128xf32>
    %169 = vector.extract_strided_slice %164 {offsets = [0, 256], sizes = [8, 128], strides = [1, 1]} : vector<8x384xf32> to vector<8x128xf32>
    %170 = arith.mulf %168, %149 : vector<8x128xf32>
    %171 = arith.mulf %167, %166 : vector<8x128xf32>
    %172 = arith.addf %170, %171 : vector<8x128xf32>
    %173 = math.tanh %172 : vector<8x128xf32>
    %174 = arith.mulf %169, %173 : vector<8x128xf32>
    %c7_i32 = arith.constant 7 : i32
    %c8_i32_43 = arith.constant 8 : i32
    %175 = arith.muli %c7_i32, %c8_i32_43 : i32
    %176 = tpu.assume_multiple %175, 8 : i32
    %177 = arith.index_cast %176 : i32 to index
    %c0_44 = arith.constant 0 : index
    %178 = vector.load %arg11[%177, %c0_44] : memref<64x512xf32, #tpu.memory_space<vmem>>, vector<8x512xf32>
    %179 = arith.truncf %174 : vector<8x128xf32> to vector<8x128xbf16>
    %cst_45 = arith.constant dense<0.000000e+00> : vector<8x512xf32>
    %180 = tpu.matmul %179, %11, %cst_45 {dimension_numbers = #tpu.dot_dimension_numbers<[1], [0], [0], [1], [0, 0, 1, 1], [], []>} : vector<8x128xbf16>, vector<128x512xbf16>, vector<8x512xf32> -> vector<8x512xf32>
    %181 = arith.addf %178, %180 : vector<8x512xf32>
    %182 = vector.extract_strided_slice %181 {offsets = [0, 0], sizes = [8, 384], strides = [1, 1]} : vector<8x512xf32> to vector<8x384xf32>
    %183 = arith.negf %182 : vector<8x384xf32>
    %184 = math.exp %183 : vector<8x384xf32>
    %cst_46 = arith.constant 1.000000e+00 : f32
    %185 = vector.broadcast %cst_46 : f32 to vector<8x384xf32>
    %186 = arith.addf %185, %184 : vector<8x384xf32>
    %187 = arith.divf %185, %186 : vector<8x384xf32>
    %188 = vector.extract_strided_slice %181 {offsets = [0, 384], sizes = [8, 128], strides = [1, 1]} : vector<8x512xf32> to vector<8x128xf32>
    %189 = math.tanh %188 : vector<8x128xf32>
    %190 = vector.extract_strided_slice %187 {offsets = [0, 0], sizes = [8, 128], strides = [1, 1]} : vector<8x384xf32> to vector<8x128xf32>
    %191 = vector.extract_strided_slice %187 {offsets = [0, 128], sizes = [8, 128], strides = [1, 1]} : vector<8x384xf32> to vector<8x128xf32>
    %192 = vector.extract_strided_slice %187 {offsets = [0, 256], sizes = [8, 128], strides = [1, 1]} : vector<8x384xf32> to vector<8x128xf32>
    %193 = arith.mulf %191, %172 : vector<8x128xf32>
    %194 = arith.mulf %190, %189 : vector<8x128xf32>
    %195 = arith.addf %193, %194 : vector<8x128xf32>
    %196 = math.tanh %195 : vector<8x128xf32>
    %197 = arith.mulf %192, %196 : vector<8x128xf32>
    %c8_i32_47 = arith.constant 8 : i32
    %c0_48 = arith.constant 0 : index
    %c0_49 = arith.constant 0 : index
    %198 = vector.load %arg9[%c0_48, %c0_49] : memref<8x128xf32, #tpu.memory_space<vmem>>, vector<8x128xf32>
    tpu.vector_store %arg9[%c0_48, %c0_49], %197 {strides = array<i32>} : memref<8x128xf32, #tpu.memory_space<vmem>>, vector<8x128xf32>,
    %c0_50 = arith.constant 0 : index
    %c0_51 = arith.constant 0 : index
    %199 = vector.load %arg10[%c0_50, %c0_51] : memref<8x128xf32, #tpu.memory_space<vmem>>, vector<8x128xf32>
    tpu.vector_store %arg10[%c0_50, %c0_51], %195 {strides = array<i32>} : memref<8x128xf32, #tpu.memory_space<vmem>>, vector<8x128xf32>,
    %c0_i32_52 = arith.constant 0 : i32
    %200 = arith.cmpi eq, %arg1, %c0_i32_52 : i32
    %201 = arith.extui %200 : i1 to i32
    %c0_i32_53 = arith.constant 0 : i32
    %202 = arith.cmpi ne, %201, %c0_i32_53 : i32
    scf.if %202 {
      %203 = arith.truncf %197 : vector<8x128xf32> to vector<8x128xbf16>
      %c0_54 = arith.constant 0 : index
      %c0_55 = arith.constant 0 : index
      %204 = vector.load %arg6[%c0_54, %c0_55] : memref<128x128xbf16, #tpu.memory_space<vmem>>, vector<128x128xbf16>
      %cst_56 = arith.constant dense<0.000000e+00> : vector<8x128xf32>
      %205 = tpu.matmul %203, %204, %cst_56 {dimension_numbers = #tpu.dot_dimension_numbers<[1], [0], [0], [1], [0, 0, 1, 1], [], []>} : vector<8x128xbf16>, vector<128x128xbf16>, vector<8x128xf32> -> vector<8x128xf32>
      %c0_57 = arith.constant 0 : index
      %c0_58 = arith.constant 0 : index
      %206 = vector.load %arg7[%c0_57, %c0_58] : memref<1x128xf32, #tpu.memory_space<vmem>>, vector<1x128xf32>
      %207 = vector.broadcast %206 : vector<1x128xf32> to vector<8x128xf32>
      %208 = arith.addf %205, %207 : vector<8x128xf32>
      %c0_59 = arith.constant 0 : index
      %c0_60 = arith.constant 0 : index
      %209 = vector.load %arg8[%c0_59, %c0_60] : memref<8x128xf32, #tpu.memory_space<vmem>>, vector<8x128xf32>
      tpu.vector_store %arg8[%c0_59, %c0_60], %208 {strides = array<i32>} : memref<8x128xf32, #tpu.memory_space<vmem>>, vector<8x128xf32>,
    } else {
    }
    return
  }
  func.func @transform_0(%arg0: i32, %arg1: i32) -> (i32, i32, i32) {
    %c0_i32 = arith.constant 0 : i32
    %c0_i32_0 = arith.constant 0 : i32
    return %arg1, %arg0, %c0_i32 : i32, i32, i32
  }
  func.func @transform_1(%arg0: i32, %arg1: i32) -> (i32, i32) {
    %c0_i32 = arith.constant 0 : i32
    %c0_i32_0 = arith.constant 0 : i32
    %c0_i32_1 = arith.constant 0 : i32
    return %c0_i32, %c0_i32_0 : i32, i32
  }
  func.func @transform_2(%arg0: i32, %arg1: i32) -> (i32, i32) {
    %c0_i32 = arith.constant 0 : i32
    %c0_i32_0 = arith.constant 0 : i32
    %c0_i32_1 = arith.constant 0 : i32
    return %c0_i32, %c0_i32_0 : i32, i32
  }
  func.func @transform_3(%arg0: i32, %arg1: i32) -> (i32, i32) {
    %c0_i32 = arith.constant 0 : i32
    %c0_i32_0 = arith.constant 0 : i32
    %c0_i32_1 = arith.constant 0 : i32
    return %c0_i32, %c0_i32_0 : i32, i32
  }
  func.func @transform_4(%arg0: i32, %arg1: i32) -> (i32, i32) {
    %c0_i32 = arith.constant 0 : i32
    %c0_i32_0 = arith.constant 0 : i32
    %c0_i32_1 = arith.constant 0 : i32
    return %c0_i32, %c0_i32_0 : i32, i32
  }
  func.func @transform_5(%arg0: i32, %arg1: i32) -> (i32, i32) {
    %c0_i32 = arith.constant 0 : i32
    %c0_i32_0 = arith.constant 0 : i32
    %c0_i32_1 = arith.constant 0 : i32
    return %c0_i32, %c0_i32_0 : i32, i32
  }
  func.func @transform_6(%arg0: i32, %arg1: i32) -> (i32, i32) {
    %c0_i32 = arith.constant 0 : i32
    %c0_i32_0 = arith.constant 0 : i32
    return %arg0, %c0_i32 : i32, i32
  }
}

</mosaic_0001>

<bundles_post_ra>
// kernel: tpu_custom_call.1
= control target key start
LH: loop header
LB: loop body
LE: loop exit
PB: predicated region body
PF: predicated region fallthrough
CT: control target
= control target key end

     0   :  { %11 = vsyncpa [#allocation6], 0  ;;  %s2968_s0 = inlined_call_operand.hbm [shape: bf16[8,8,128], index: 0, kind: input, shape index: {}]   ;;  %s2969_s1 = inlined_call_operand.hbm [shape: bf16[128,512], index: 1, kind: input, shape index: {}]   ;;  %s2970_s2 = inlined_call_operand.hbm [shape: bf16[128,512], index: 2, kind: input, shape index: {}]   ;;  %s2971_s3 = inlined_call_operand.vmem [shape: f32[1,512], index: 3, kind: input, shape index: {}]   ;;  %s2972_s4 = inlined_call_operand.hbm [shape: bf16[128,128], index: 4, kind: input, shape index: {}]   ;;  %s2973_s5 = inlined_call_operand.vmem [shape: f32[1,128], index: 5, kind: input, shape index: {}]   ;;  %s2974_s6 = inlined_call_operand.hbm [shape: f32[8,128], index: 6, kind: output, shape index: {}]  }
   0x1   :  { %12 = vsyncpa [#allocation9], 0 }
   0x2   :  { %13 = vsyncpa [#allocation12], 0 }
   0x3   :  { %14 = vsyncpa [#allocation7], 0  ;;  %s2319_s21 = smov [#allocation8]   ;;  %s2201_s25 = scalar_lea.hbm %s2969_s1, 4096 }
   0x4   :  { %s32_s22 = sshll.u32 %s2319_s21, 4  ;;  %p2202_p0 = scmp.ne.s32.totalorder %s2969_s1, %s2201_s25  ;;  %s33_s22 = int_to_ptr.vmem [resolvable:$true] %s32_s22 }
   0x5   :  { %p2205_p1 = scmp.lt.u32.totalorder %s2201_s25, %s2969_s1 }
   0x7   :  { %p2207_p2 = pnand %p2205_p1, %p2202_p0 }
   0x9   :  { %2210 = shalt.err (!%p2207_p2)
}
   0xa   :  { %s2211_s30 = scalar_lea.vmem %s33_s22, 4096  ;;  %p2216_p4 = scmp.lt.s32.totalorder %s33_s22, %s33_s22 }
   0xb   :  { %p2212_p3 = scmp.ne.s32.totalorder %s33_s22, %s2211_s30  ;;  %p2217_p5 = scmp.lt.s32.totalorder %s2211_s30, %s2211_s30 }
   0xd   :  { %p2218_p6 = por %p2217_p5, %p2216_p4 }
   0xf   :  { %p2219_p7 = pnand %p2218_p6, %p2212_p3 }
  0x11   :  { %2222 = shalt.err (!%p2219_p7)
}
  0x12   :  { %s2320_s7 = smov 256   ;;  %s2321_s8 = smov 16  }
  0x13   :  { %38 = dma.hbm_to_vmem [thread:$0]  %s2969_s1, 4096, %s33_s22, [#allocation9], %s2320_s7, %s2320_s7, %s2321_s8  }
  0x14   :  { %s2322_s11 = smov [#allocation5]   ;;  %s2223_s15 = scalar_lea.hbm %s2968_s0, 512 }
  0x15   :  { %s20_s12 = sshll.u32 %s2322_s11, 4  ;;  %p2224_p8 = scmp.ne.s32.totalorder %s2968_s0, %s2223_s15  ;;  %s21_s12 = int_to_ptr.vmem [resolvable:$true] %s20_s12 }
  0x16   :  { %p2227_p9 = scmp.lt.u32.totalorder %s2223_s15, %s2968_s0 }
  0x18   :  { %p2229_p10 = pnand %p2227_p9, %p2224_p8 }
  0x1a   :  { %2232 = shalt.err (!%p2229_p10)
}
  0x1b   :  { %s2233_s20 = scalar_lea.vmem %s21_s12, 512  ;;  %p2238_p12 = scmp.lt.s32.totalorder %s21_s12, %s21_s12 }
  0x1c   :  { %p2234_p11 = scmp.ne.s32.totalorder %s21_s12, %s2233_s20  ;;  %p2239_p13 = scmp.lt.s32.totalorder %s2233_s20, %s2233_s20 }
  0x1e   :  { %p2240_p0 = por %p2239_p13, %p2238_p12 }
  0x20   :  { %p2241_p1 = pnand %p2240_p0, %p2234_p11 }
  0x22   :  { %2244 = shalt.err (!%p2241_p1)
}
  0x23   :  { %s2323_s1 = smov 64   ;;  %s2324_s21 = smov 4  }
  0x24   :  { %26 = dma.hbm_to_vmem [thread:$0]  %s2968_s0, 512, %s21_s12, [#allocation6], %s2323_s1, %s2323_s1, %s2324_s21  }
  0x25   :  { %s2325_s24 = smov [#allocation10]   ;;  %s2326_s26 = smov [#allocation11]  }
  0x26   :  { %s44_s25 = sshll.u32 %s2325_s24, 4  ;;  %s58_s27 = sshll.u32 %s2326_s26, 4  ;;  %s45_s25 = int_to_ptr.vmem [resolvable:$true] %s44_s25  ;;  %s2397_s27 = int_to_ptr.vmem [resolvable:$true] %s58_s27 }
  0x27   :  { %s2245_s30 = scalar_lea.hbm %s2970_s2, 4096 }
  0x28   :  { %p2246_p2 = scmp.ne.s32.totalorder %s2970_s2, %s2245_s30  ;;  %p2249_p3 = scmp.lt.u32.totalorder %s2245_s30, %s2970_s2 }
  0x2a   :  { %p2251_p4 = pnand %p2249_p3, %p2246_p2 }
  0x2c   :  { %2254 = shalt.err (!%p2251_p4)
}
  0x2d   :  { %s2255_s0 = scalar_lea.vmem %s45_s25, 4096  ;;  %p2260_p6 = scmp.lt.s32.totalorder %s45_s25, %s45_s25 }
  0x2e   :  { %p2256_p5 = scmp.ne.s32.totalorder %s45_s25, %s2255_s0  ;;  %p2261_p7 = scmp.lt.s32.totalorder %s2255_s0, %s2255_s0 }
  0x30   :  { %p2262_p8 = por %p2261_p7, %p2260_p6 }
  0x32   :  { %p2263_p9 = pnand %p2262_p8, %p2256_p5 }
  0x34   :  { %2266 = shalt.err (!%p2263_p9)
}
  0x35   :  { %50 = dma.hbm_to_vmem [thread:$0]  %s2970_s2, 4096, %s45_s25, [#allocation9], %s2320_s7, %s2320_s7, %s2321_s8  }
  0x36   :  { %s2267_s17 = scalar_lea.hbm %s2972_s4, 1024 }
  0x37   :  { %p2268_p10 = scmp.ne.s32.totalorder %s2972_s4, %s2267_s17  ;;  %p2271_p11 = scmp.lt.u32.totalorder %s2267_s17, %s2972_s4 }
  0x39   :  { %p2273_p12 = pnand %p2271_p11, %p2268_p10 }
  0x3b   :  { %2276 = shalt.err (!%p2273_p12)
}
  0x3c   :  { %s2277_s23 = scalar_lea.vmem %s2397_s27, 1024  ;;  %p2282_p0 = scmp.lt.s32.totalorder %s2397_s27, %s2397_s27 }
  0x3d   :  { %p2278_p13 = scmp.ne.s32.totalorder %s2397_s27, %s2277_s23  ;;  %p2283_p1 = scmp.lt.s32.totalorder %s2277_s23, %s2277_s23 }
  0x3f   :  { %p2284_p2 = por %p2283_p1, %p2282_p0 }
  0x41   :  { %p2285_p3 = pnand %p2284_p2, %p2278_p13 }
  0x43   :  { %2288 = shalt.err (!%p2285_p3)
}
  0x44   :  { %64 = dma.hbm_to_vmem [thread:$0]  %s2972_s4, 1024, %s2397_s27, [#allocation12], %s2323_s1, %s2323_s1, %s2324_s21  }
  0x45   :  { %2311 = dma.done.wait [#allocation6], 512  }
  0x46   :  { %2312 = vsyncadd [#allocation6], 4294966784 }
  0x47   :  { %2313 = dma.done.wait [#allocation9], 8192  }
  0x48   :  { %2314 = vsyncadd [#allocation9], 4294959104 }
  0x49   :  { %2315 = dma.done.wait [#allocation12], 1024  }
  0x4a   :  { %2316 = vsyncadd [#allocation12], 4294966272  ;;  %v2975_v0 = vmov 0   ;;  %v1933_v1 = vld [vmem:[#allocation8 + $0x4] ss:$16 sps:$4 sm:$0xff]   ;;  %v1994_v44 = vld [vmem:[#allocation5 + $0x8] sm:$0xff]  }
  0x4b   :  { %364 = vmatprep.mubr.bf16.mxu0 %v2975_v0  ;;  %437 = vmatprep.mubr.bf16.mxu1 %v2975_v0  ;;  %v1935_v2 = vld [vmem:[#allocation8 + $0xc] ss:$16 sps:$4 sm:$0xff]   ;;  %v1937_v3 = vld [vmem:[#allocation8] ss:$16 sps:$4 sm:$0xff]   ;;  %v1938_v4 = vld [vmem:[#allocation8 + $0x8] ss:$16 sps:$4 sm:$0xff]  }
  0x4c   :  { %332 = vmatprep.subr.bf16.mxu0 %v1933_v1  ;;  %405 = vmatprep.subr.bf16.mxu1 %v1935_v2  ;;  %v1939_v5 = vld [vmem:[#allocation8 + $0x24] ss:$16 sps:$4 sm:$0xff]   ;;  %v1941_v6 = vld [vmem:[#allocation8 + $0x2c] ss:$16 sps:$4 sm:$0xff]   ;;  %v1943_v7 = vld [vmem:[#allocation8 + $0x20] ss:$16 sps:$4 sm:$0xff]  }
  0x4d   :  { %333 = vmatpush1.bf16.msra.mxu0 %v1937_v3  ;;  %406 = vmatpush1.bf16.msra.mxu1 %v1938_v4  ;;  %v1944_v8 = vld [vmem:[#allocation8 + $0x28] ss:$16 sps:$4 sm:$0xff]   ;;  %v1945_v9 = vld [vmem:[#allocation8 + $0x44] ss:$16 sps:$4 sm:$0xff]   ;;  %v1947_v10 = vld [vmem:[#allocation8 + $0x4c] ss:$16 sps:$4 sm:$0xff]  }
  0x4e   :  { %334 = vmatprep.subr.bf16.mxu0 %v1939_v5  ;;  %407 = vmatprep.subr.bf16.mxu1 %v1941_v6  ;;  %v1949_v11 = vld [vmem:[#allocation8 + $0x40] ss:$16 sps:$4 sm:$0xff]   ;;  %v1950_v12 = vld [vmem:[#allocation8 + $0x48] ss:$16 sps:$4 sm:$0xff]   ;;  %v1951_v13 = vld [vmem:[#allocation8 + $0x64] ss:$16 sps:$4 sm:$0xff]  }
  0x4f   :  { %v1953_v14 = vld [vmem:[#allocation8 + $0x6c] ss:$16 sps:$4 sm:$0xff]   ;;  %v1955_v15 = vld [vmem:[#allocation8 + $0x60] ss:$16 sps:$4 sm:$0xff]   ;;  %v1956_v16 = vld [vmem:[#allocation8 + $0x68] ss:$16 sps:$4 sm:$0xff]  }
  0x50   :  { %v1957_v17 = vld [vmem:[#allocation8 + $0x84] ss:$16 sps:$4 sm:$0xff]   ;;  %v1959_v18 = vld [vmem:[#allocation8 + $0x8c] ss:$16 sps:$4 sm:$0xff]   ;;  %v1961_v19 = vld [vmem:[#allocation8 + $0x80] ss:$16 sps:$4 sm:$0xff]  }
  0x51   :  { %335 = vmatpush1.bf16.msra.mxu0 %v1943_v7  ;;  %408 = vmatpush1.bf16.msra.mxu1 %v1944_v8  ;;  %v1962_v20 = vld [vmem:[#allocation8 + $0x88] ss:$16 sps:$4 sm:$0xff]   ;;  %v1963_v21 = vld [vmem:[#allocation8 + $0xa4] ss:$16 sps:$4 sm:$0xff]   ;;  %v1965_v22 = vld [vmem:[#allocation8 + $0xac] ss:$16 sps:$4 sm:$0xff]   ;;  %v128_v7 = vlaneseq }
  0x52   :  { %336 = vmatprep.subr.bf16.mxu0 %v1945_v9  ;;  %409 = vmatprep.subr.bf16.mxu1 %v1947_v10  ;;  %v1967_v23 = vld [vmem:[#allocation8 + $0xa0] ss:$16 sps:$4 sm:$0xff]   ;;  %v1968_v24 = vld [vmem:[#allocation8 + $0xa8] ss:$16 sps:$4 sm:$0xff]   ;;  %v1969_v25 = vld [vmem:[#allocation8 + $0xc4] ss:$16 sps:$4 sm:$0xff]  }
  0x53   :  { %v1971_v26 = vld [vmem:[#allocation8 + $0xcc] ss:$16 sps:$4 sm:$0xff]   ;;  %v1973_v27 = vld [vmem:[#allocation8 + $0xc0] ss:$16 sps:$4 sm:$0xff]   ;;  %v1974_v28 = vld [vmem:[#allocation8 + $0xc8] ss:$16 sps:$4 sm:$0xff]  }
  0x54   :  { %v1975_v29 = vld [vmem:[#allocation8 + $0xe4] ss:$16 sps:$4 sm:$0xff]   ;;  %v1977_v30 = vld [vmem:[#allocation8 + $0xec] ss:$16 sps:$4 sm:$0xff]   ;;  %v1979_v31 = vld [vmem:[#allocation8 + $0xe0] ss:$16 sps:$4 sm:$0xff]  }
  0x55   :  { %337 = vmatpush1.bf16.msra.mxu0 %v1949_v11  ;;  %410 = vmatpush1.bf16.msra.mxu1 %v1950_v12  ;;  %v1980_v32 = vld [vmem:[#allocation8 + $0xe8] ss:$16 sps:$4 sm:$0xff]   ;;  %v2436_v33 = vld [vmem:[#allocation10 + $0x4] ss:$16 sps:$4 sm:$0xff]   ;;  %v2438_v34 = vld [vmem:[#allocation10 + $0xc] ss:$16 sps:$4 sm:$0xff]  }
  0x56   :  { %338 = vmatprep.subr.bf16.mxu0 %v1951_v13  ;;  %411 = vmatprep.subr.bf16.mxu1 %v1953_v14  ;;  %v1981_v35 = vld [vmem:[#allocation5] sm:$0xff]   ;;  %v2442_v37 = vld [vmem:[#allocation10 + $0x8] ss:$16 sps:$4 sm:$0xff]   ;;  %v2448_v39 = vld [vmem:[#allocation10 + $0x2c] ss:$16 sps:$4 sm:$0xff]   ;;  %v2328_v6 = vmov 0.0|0.0  }
  0x57   :  { %v2440_v36 = vld [vmem:[#allocation10] ss:$16 sps:$4 sm:$0xff]   ;;  %v2446_v38 = vld [vmem:[#allocation10 + $0x24] ss:$16 sps:$4 sm:$0xff]   ;;  %v2454_v41 = vld [vmem:[#allocation10 + $0x28] ss:$16 sps:$4 sm:$0xff]  }
  0x58   :  { %v2450_v40 = vld [vmem:[#allocation10 + $0x20] ss:$16 sps:$4 sm:$0xff]   ;;  %v2458_v42 = vld [vmem:[#allocation10 + $0x44] ss:$16 sps:$4 sm:$0xff]   ;;  %v2460_v43 = vld [vmem:[#allocation10 + $0x4c] ss:$16 sps:$4 sm:$0xff]  }
  0x59   :  { %339 = vmatpush1.bf16.msra.mxu0 %v1955_v15  ;;  %412 = vmatpush1.bf16.msra.mxu1 %v1956_v16  ;;  %v2464_v45 = vld [vmem:[#allocation10 + $0x40] ss:$16 sps:$4 sm:$0xff]   ;;  %v2466_v46 = vld [vmem:[#allocation10 + $0x48] ss:$16 sps:$4 sm:$0xff]   ;;  %v2470_v47 = vld [vmem:[#allocation10 + $0x64] ss:$16 sps:$4 sm:$0xff]  }
  0x5a   :  { %340 = vmatprep.subr.bf16.mxu0 %v1957_v17  ;;  %413 = vmatprep.subr.bf16.mxu1 %v1959_v18  ;;  %v2474_v48 = vld [vmem:[#allocation10 + $0x6c] ss:$16 sps:$4 sm:$0xff]   ;;  %v2476_v49 = vld [vmem:[#allocation10 + $0x60] ss:$16 sps:$4 sm:$0xff]   ;;  %v2478_v50 = vld [vmem:[#allocation10 + $0x68] ss:$16 sps:$4 sm:$0xff]  }
  0x5b   :  { %v2482_v51 = vld [vmem:[#allocation10 + $0x84] ss:$16 sps:$4 sm:$0xff]   ;;  %v2486_v52 = vld [vmem:[#allocation10 + $0x8c] ss:$16 sps:$4 sm:$0xff]   ;;  %v2490_v54 = vld [vmem:[#allocation10 + $0x80] ss:$16 sps:$4 sm:$0xff]  }
  0x5c   :  { %v2007_v53 = vld [vmem:[#allocation5 + $0x10] sm:$0xff]   ;;  %v2492_v55 = vld [vmem:[#allocation10 + $0x88] ss:$16 sps:$4 sm:$0xff]   ;;  %v2496_v57 = vld [vmem:[#allocation10 + $0xac] ss:$16 sps:$4 sm:$0xff]   ;;  %v129_v8 = vshrl.u32 %v128_v7, 7 }
  0x5d   :  { %341 = vmatpush1.bf16.msra.mxu0 %v1961_v19  ;;  %414 = vmatpush1.bf16.msra.mxu1 %v1962_v20  ;;  %v2494_v56 = vld [vmem:[#allocation10 + $0xa4] ss:$16 sps:$4 sm:$0xff]   ;;  %v2504_v58 = vld [vmem:[#allocation10 + $0xa0] ss:$16 sps:$4 sm:$0xff]   ;;  %v2506_v59 = vld [vmem:[#allocation10 + $0xa8] ss:$16 sps:$4 sm:$0xff]  }
  0x5e   :  { %342 = vmatprep.subr.bf16.mxu0 %v1963_v21  ;;  %415 = vmatprep.subr.bf16.mxu1 %v1965_v22  ;;  %v2510_v60 = vld [vmem:[#allocation10 + $0xc4] ss:$16 sps:$4 sm:$0xff]   ;;  %v2512_v61 = vld [vmem:[#allocation10 + $0xcc] ss:$16 sps:$4 sm:$0xff]   ;;  %v2518_v63 = vld [vmem:[#allocation10 + $0xc0] ss:$16 sps:$4 sm:$0xff]  }
  0x5f   :  { %v2020_v62 = vld [vmem:[#allocation5 + $0x18] sm:$0xff]   ;;  %v2524_v2 = vld [vmem:[#allocation10 + $0xe4] ss:$16 sps:$4 sm:$0xff]   ;;  %v2530_v4 = vld [vmem:[#allocation10 + $0xe0] ss:$16 sps:$4 sm:$0xff]   ;;  %v138_v9 = vsub.s32 2, %v129_v8 }
  0x60   :  { %v2520_v1 = vld [vmem:[#allocation10 + $0xc8] ss:$16 sps:$4 sm:$0xff]   ;;  %v2526_v3 = vld [vmem:[#allocation10 + $0xec] ss:$16 sps:$4 sm:$0xff]   ;;  %v142_v10 = vsub.s32 3, %v129_v8  ;;  %v130_v11 = vsub.s32 0, %v129_v8 }
  0x61   :  { %343 = vmatpush1.bf16.msra.mxu0 %v1967_v23  ;;  %416 = vmatpush1.bf16.msra.mxu1 %v1968_v24  ;;  %v2532_v5 = vld [vmem:[#allocation10 + $0xe8] ss:$16 sps:$4 sm:$0xff]   ;;  %v126_v12 = vld [vmem:[%s2971_s3] sm:$0xf]  ;;  %v134_v13 = vsub.s32 1, %v129_v8  ;;  %vm2330_vm0 = vmmov 0  }
  0x62   :  { %344 = vmatprep.subr.bf16.mxu0 %v1969_v25  ;;  %417 = vmatprep.subr.bf16.mxu1 %v1971_v26  ;;  %v2579_v14 = vrot.slane %v126_v12, %v138_v9  ;;  %v2585_v17 = vrot.slane %v126_v12, %v142_v10  ;;  %v131_v18 = vrot.slane %v126_v12, %v130_v11  ;;  %s2331_s21 = smov [#allocation13]  }
  0x63   :  { %v135_v21 = vrot.slane %v126_v12, %v134_v13  ;;  %s1772_s24 = sshll.u32 %s2331_s21, 4  ;;  %s1773_s24 = int_to_ptr.vmem [resolvable:$true] %s1772_s24 }
  0x64   :  { %s2289_s25 = scalar_lea.vmem %s1773_s24, 128  ;;  %p2294_p5 = scmp.lt.s32.totalorder %s1773_s24, %s1773_s24 }
  0x65   :  { %345 = vmatpush1.bf16.msra.mxu0 %v1973_v27  ;;  %418 = vmatpush1.bf16.msra.mxu1 %v1974_v28  ;;  %p2290_p4 = scmp.ne.s32.totalorder %s1773_s24, %s2289_s25  ;;  %p2295_p6 = scmp.lt.s32.totalorder %s2289_s25, %s2289_s25 }
  0x66   :  { %346 = vmatprep.subr.bf16.mxu0 %v1975_v29  ;;  %419 = vmatprep.subr.bf16.mxu1 %v1977_v30 }
  0x67   :  { %p2296_p7 = por %p2295_p6, %p2294_p5 }
  0x69   :  { %347 = vmatpush1.bf16.msra.mxu0 %v1979_v31  ;;  %420 = vmatpush1.bf16.msra.mxu1 %v1980_v32  ;;  %p2297_p8 = pnand %p2296_p7, %p2290_p4 }
  0x6a   :  { %712 = vmatprep.subr.bf16.mxu0 %v2436_v33  ;;  %753 = vmatprep.subr.bf16.mxu1 %v2438_v34 }
  0x6c   :  { %365 = vmatmul.mubr.bf16.vlgmr.msra.gmra.mrb[0].mxu0 %v1981_v35  ;;  %438 = vmatmul.mubr.bf16.vlgmr.msra.gmra.mrb[0].mxu1 %v1981_v35 }
  0x6d   :  { %713 = vmatpush1.bf16.msra.mxu0 %v2440_v36  ;;  %754 = vmatpush1.bf16.msra.mxu1 %v2442_v37 }
  0x6e   :  { %714 = vmatprep.subr.bf16.mxu0 %v2446_v38  ;;  %755 = vmatprep.subr.bf16.mxu1 %v2448_v39 }
  0x6f   :  { %374 = vmatprep.mubr.bf16.mxu0 %v2975_v0  ;;  %447 = vmatprep.mubr.bf16.mxu1 %v2975_v0 }
  0x71   :  { %715 = vmatpush1.bf16.msra.mxu0 %v2450_v40  ;;  %756 = vmatpush1.bf16.msra.mxu1 %v2454_v41 }
  0x72   :  { %716 = vmatprep.subr.bf16.mxu0 %v2458_v42  ;;  %757 = vmatprep.subr.bf16.mxu1 %v2460_v43 }
  0x74   :  { %375 = vmatmul.mubr.bf16.gmra.mrb[4].mxu0 %v1994_v44  ;;  %448 = vmatmul.mubr.bf16.gmra.mrb[4].mxu1 %v1994_v44 }
  0x75   :  { %717 = vmatpush1.bf16.msra.mxu0 %v2464_v45  ;;  %758 = vmatpush1.bf16.msra.mxu1 %v2466_v46 }
  0x76   :  { %718 = vmatprep.subr.bf16.mxu0 %v2470_v47  ;;  %759 = vmatprep.subr.bf16.mxu1 %v2474_v48 }
  0x77   :  { %384 = vmatprep.mubr.bf16.mxu0 %v2975_v0  ;;  %457 = vmatprep.mubr.bf16.mxu1 %v2975_v0 }
  0x79   :  { %719 = vmatpush1.bf16.msra.mxu0 %v2476_v49  ;;  %760 = vmatpush1.bf16.msra.mxu1 %v2478_v50 }
  0x7a   :  { %720 = vmatprep.subr.bf16.mxu0 %v2482_v51  ;;  %761 = vmatprep.subr.bf16.mxu1 %v2486_v52 }
  0x7c   :  { %385 = vmatmul.mubr.bf16.gmra.mrb[8].mxu0 %v2007_v53  ;;  %458 = vmatmul.mubr.bf16.gmra.mrb[8].mxu1 %v2007_v53 }
  0x7d   :  { %721 = vmatpush1.bf16.msra.mxu0 %v2490_v54  ;;  %762 = vmatpush1.bf16.msra.mxu1 %v2492_v55 }
  0x7e   :  { %722 = vmatprep.subr.bf16.mxu0 %v2494_v56  ;;  %763 = vmatprep.subr.bf16.mxu1 %v2496_v57 }
  0x7f   :  { %394 = vmatprep.mubr.bf16.mxu0 %v2975_v0  ;;  %467 = vmatprep.mubr.bf16.mxu1 %v2975_v0 }
  0x81   :  { %723 = vmatpush1.bf16.msra.mxu0 %v2504_v58  ;;  %764 = vmatpush1.bf16.msra.mxu1 %v2506_v59 }
  0x82   :  { %724 = vmatprep.subr.bf16.mxu0 %v2510_v60  ;;  %765 = vmatprep.subr.bf16.mxu1 %v2512_v61 }
  0x84   :  { %395 = vmatmul.mubr.bf16.gmra.mrb[12].mxu0 %v2020_v62  ;;  %468 = vmatmul.mubr.bf16.gmra.mrb[12].mxu1 %v2020_v62 }
  0x85   :  { %725 = vmatpush1.bf16.msra.mxu0 %v2518_v63  ;;  %766 = vmatpush1.bf16.msra.mxu1 %v2520_v1 }
  0x86   :  { %726 = vmatprep.subr.bf16.mxu0 %v2524_v2  ;;  %767 = vmatprep.subr.bf16.mxu1 %v2526_v3 }
  0x87   :  { %744 = vmatprep.mubr.bf16.mxu0 %v2975_v0  ;;  %785 = vmatprep.mubr.bf16.mxu1 %v2975_v0 }
  0x89   :  { %727 = vmatpush1.bf16.msra.mxu0 %v2530_v4  ;;  %768 = vmatpush1.bf16.msra.mxu1 %v2532_v5 }
  0x8a   :  { %830 = vmatprep.subr.bf16.mxu0 %v2436_v33  ;;  %871 = vmatprep.subr.bf16.mxu1 %v2438_v34 }
  0x8c   :  { %745 = vmatmul.mubr.bf16.vlgmr.msra.gmra.mrb[16].mxu0 %v2328_v6  ;;  %786 = vmatmul.mubr.bf16.vlgmr.msra.gmra.mrb[16].mxu1 %v2328_v6 }
  0x8d   :  { %831 = vmatpush1.bf16.msra.mxu0 %v2440_v36  ;;  %872 = vmatpush1.bf16.msra.mxu1 %v2442_v37 }
  0x8e   :  { %832 = vmatprep.subr.bf16.mxu0 %v2446_v38  ;;  %873 = vmatprep.subr.bf16.mxu1 %v2448_v39 }
  0x8f   :  { %862 = vmatprep.mubr.bf16.mxu0 %v2975_v0  ;;  %903 = vmatprep.mubr.bf16.mxu1 %v2975_v0 }
  0x91   :  { %833 = vmatpush1.bf16.msra.mxu0 %v2450_v40  ;;  %874 = vmatpush1.bf16.msra.mxu1 %v2454_v41 }
  0x92   :  { %834 = vmatprep.subr.bf16.mxu0 %v2458_v42  ;;  %875 = vmatprep.subr.bf16.mxu1 %v2460_v43 }
  0x95   :  { %835 = vmatpush1.bf16.msra.mxu0 %v2464_v45  ;;  %876 = vmatpush1.bf16.msra.mxu1 %v2466_v46 }
  0x96   :  { %836 = vmatprep.subr.bf16.mxu0 %v2470_v47  ;;  %877 = vmatprep.subr.bf16.mxu1 %v2474_v48 }
  0x99   :  { %837 = vmatpush1.bf16.msra.mxu0 %v2476_v49  ;;  %878 = vmatpush1.bf16.msra.mxu1 %v2478_v50 }
  0x9a   :  { %838 = vmatprep.subr.bf16.mxu0 %v2482_v51  ;;  %879 = vmatprep.subr.bf16.mxu1 %v2486_v52 }
  0x9d   :  { %839 = vmatpush1.bf16.msra.mxu0 %v2490_v54  ;;  %880 = vmatpush1.bf16.msra.mxu1 %v2492_v55 }
  0x9e   :  { %840 = vmatprep.subr.bf16.mxu0 %v2494_v56  ;;  %881 = vmatprep.subr.bf16.mxu1 %v2496_v57 }
  0xa1   :  { %841 = vmatpush1.bf16.msra.mxu0 %v2504_v58  ;;  %882 = vmatpush1.bf16.msra.mxu1 %v2506_v59 }
  0xa2   :  { %842 = vmatprep.subr.bf16.mxu0 %v2510_v60  ;;  %883 = vmatprep.subr.bf16.mxu1 %v2512_v61 }
  0xa5   :  { %843 = vmatpush1.bf16.msra.mxu0 %v2518_v63  ;;  %884 = vmatpush1.bf16.msra.mxu1 %v2520_v1 }
  0xa6   :  { %844 = vmatprep.subr.bf16.mxu0 %v2524_v2  ;;  %885 = vmatprep.subr.bf16.mxu1 %v2526_v3 }
  0xa9   :  { %845 = vmatpush1.bf16.msra.mxu0 %v2530_v4  ;;  %886 = vmatpush1.bf16.msra.mxu1 %v2532_v5 }
  0xaa   :  { %948 = vmatprep.subr.bf16.mxu0 %v2436_v33  ;;  %989 = vmatprep.subr.bf16.mxu1 %v2438_v34 }
 0x13f   :  { %v2581_v15 = vpop.f32.mrb[0].mxu0  ;;  %v2583_v16 = vpop.f32.mrb[0].mxu1 }
 0x140   :  { %v368_v19 = vpop.f32.mrb[1].mxu0  ;;  %v441_v20 = vpop.f32.mrb[1].mxu1 }
 0x141   :  { %v370_v22 = vpop.f32.mrb[2].mxu0  ;;  %v443_v23 = vpop.f32.mrb[2].mxu1 }
 0x142   :  { %v2587_v24 = vadd.f32 %v370_v22, %v131_v18  ;;  %v372_v25 = vpop.f32.mrb[3].mxu0  ;;  %v2590_v26 = vadd.f32 %v443_v23, %v2579_v14  ;;  %v445_v27 = vpop.f32.mrb[3].mxu1 }
 0x143   :  { %v2592_v28 = vadd.f32 %v372_v25, %v135_v21  ;;  %v2595_v29 = vadd.f32 %v445_v27, %v2585_v17 }
 0x147   :  { %v376_v30 = vpop.f32.mrb[4].mxu0  ;;  %v449_v31 = vpop.f32.mrb[4].mxu1 }
 0x148   :  { %v2597_v32 = vadd.f32 %v376_v30, %v131_v18  ;;  %v378_v35 = vpop.f32.mrb[5].mxu0  ;;  %v2600_v44 = vadd.f32 %v449_v31, %v2579_v14  ;;  %v451_v53 = vpop.f32.mrb[5].mxu1 }
 0x149   :  { %v2602_v62 = vadd.f32 %v378_v35, %v135_v21  ;;  %v380_v6 = vpop.f32.mrb[6].mxu0  ;;  %v2605_v7 = vadd.f32 %v451_v53, %v2585_v17  ;;  %v453_v8 = vpop.f32.mrb[6].mxu1 }
 0x14a   :  { %v2607_v9 = vadd.f32 %v380_v6, %v131_v18  ;;  %v382_v10 = vpop.f32.mrb[7].mxu0  ;;  %v2610_v11 = vadd.f32 %v453_v8, %v2579_v14  ;;  %v455_v12 = vpop.f32.mrb[7].mxu1 }
 0x14b   :  { %2977 = vst [vmem:[#allocation18_spill] sm:$0xff] %v2605_v7  ;;  %v2612_v13 = vadd.f32 %v382_v10, %v135_v21  ;;  %v2615_v22 = vadd.f32 %v455_v12, %v2585_v17 }
 0x14c   :  { %2978 = vst [vmem:[#allocation19_spill] sm:$0xff] %v2607_v9  ;;  %2979 = vst [vmem:[#allocation20_spill] sm:$0xff] %v2610_v11 }
 0x14d   :  { %2980 = vst [vmem:[#allocation21_spill] sm:$0xff] %v2612_v13  ;;  %2981 = vst [vmem:[#allocation22_spill] sm:$0xff] %v2615_v22 }
 0x14f   :  { %v386_v23 = vpop.f32.mrb[8].mxu0  ;;  %v459_v25 = vpop.f32.mrb[8].mxu1 }
 0x150   :  { %v2617_v27 = vadd.f32 %v386_v23, %v131_v18  ;;  %v388_v30 = vpop.f32.mrb[9].mxu0  ;;  %v2620_v31 = vadd.f32 %v459_v25, %v2579_v14  ;;  %v461_v35 = vpop.f32.mrb[9].mxu1 }
 0x151   :  { %v2622_v53 = vadd.f32 %v388_v30, %v135_v21  ;;  %v390_v6 = vpop.f32.mrb[10].mxu0  ;;  %v2625_v8 = vadd.f32 %v461_v35, %v2585_v17  ;;  %v463_v10 = vpop.f32.mrb[10].mxu1 }
 0x152   :  { %2982 = vst [vmem:[#allocation23_spill] sm:$0xff] %v2617_v27  ;;  %2983 = vst [vmem:[#allocation24_spill] sm:$0xff] %v2620_v31  ;;  %v2627_v0 = vadd.f32 %v390_v6, %v131_v18  ;;  %v392_v12 = vpop.f32.mrb[11].mxu0  ;;  %v2630_v22 = vadd.f32 %v463_v10, %v2579_v14  ;;  %v465_v23 = vpop.f32.mrb[11].mxu1 }
 0x153   :  { %2984 = vst [vmem:[#allocation25_spill] sm:$0xff] %v2622_v53  ;;  %2985 = vst [vmem:[#allocation26_spill] sm:$0xff] %v2625_v8  ;;  %v2632_v27 = vadd.f32 %v392_v12, %v135_v21  ;;  %v2635_v25 = vadd.f32 %v465_v23, %v2585_v17 }
 0x154   :  { %2986 = vst [vmem:[#allocation27_spill] sm:$0xff] %v2627_v0  ;;  %2987 = vst [vmem:[#allocation28_spill] sm:$0xff] %v2630_v22 }
 0x155   :  { %2988 = vst [vmem:[#allocation29_spill] sm:$0xff] %v2632_v27  ;;  %2989 = vst [vmem:[#allocation30_spill] sm:$0xff] %v2635_v25 }
 0x157   :  { %v396_v31 = vpop.f32.mrb[12].mxu0  ;;  %v469_v30 = vpop.f32.mrb[12].mxu1 }
 0x158   :  { %v2637_v53 = vadd.f32 %v396_v31, %v131_v18  ;;  %v398_v13 = vpop.f32.mrb[13].mxu0  ;;  %v2640_v35 = vadd.f32 %v469_v30, %v2579_v14  ;;  %v471_v6 = vpop.f32.mrb[13].mxu1 }
 0x159   :  { %v2642_v0 = vadd.f32 %v398_v13, %v135_v21  ;;  %v400_v8 = vpop.f32.mrb[14].mxu0  ;;  %v2645_v10 = vadd.f32 %v471_v6, %v2585_v17  ;;  %v473_v12 = vpop.f32.mrb[14].mxu1  ;;  %v367_v13 = vadd.f32 %v2581_v15, %v131_v18  ;;  %v369_v6 = vadd.f32 %v368_v19, %v135_v21 }
 0x15a   :  { %2990 = vst [vmem:[#allocation31_spill] sm:$0xff] %v2637_v53  ;;  %2991 = vst [vmem:[#allocation32_spill] sm:$0xff] %v2640_v35  ;;  %v2647_v27 = vadd.f32 %v400_v8, %v131_v18  ;;  %v402_v23 = vpop.f32.mrb[15].mxu0  ;;  %v2650_v25 = vadd.f32 %v473_v12, %v2579_v14  ;;  %v475_v31 = vpop.f32.mrb[15].mxu1 }
 0x15b   :  { %2992 = vst [vmem:[#allocation33_spill] sm:$0xff] %v2642_v0  ;;  %2993 = vst [vmem:[#allocation34_spill] sm:$0xff] %v2645_v10  ;;  %v2652_v53 = vadd.f32 %v402_v23, %v135_v21  ;;  %v2655_v30 = vadd.f32 %v475_v31, %v2585_v17  ;;  %v440_v0 = vadd.f32 %v2583_v16, %v2579_v14 }
 0x15c   :  { %2994 = vst [vmem:[#allocation35_spill] sm:$0xff] %v2647_v27  ;;  %2995 = vst [vmem:[#allocation36_spill] sm:$0xff] %v2650_v25  ;;  %v442_v10 = vadd.f32 %v441_v20, %v2585_v17 }
 0x15d   :  { %2996 = vst [vmem:[#allocation37_spill] sm:$0xff] %v2652_v53  ;;  %2997 = vst [vmem:[#allocation38_spill] sm:$0xff] %v2655_v30 }
 0x15f   :  { %v746_v8 = vpop.f32.mrb[16].mxu0  ;;  %v787_v27 = vpop.f32.mrb[16].mxu1 }
 0x160   :  { %v794_v35 = vadd.f32 %v746_v8, %v367_v13  ;;  %v796_v22 = vadd.f32 %v787_v27, %v440_v0  ;;  %v748_v12 = vpop.f32.mrb[17].mxu0  ;;  %v789_v25 = vpop.f32.mrb[17].mxu1 }
 0x161   :  { %v795_v11 = vadd.f32 %v748_v12, %v369_v6  ;;  %v797_v23 = vadd.f32 %v789_v25, %v442_v10  ;;  %v750_v53 = vpop.f32.mrb[18].mxu0  ;;  %v791_v9 = vpop.f32.mrb[18].mxu1 }
 0x162   :  { %v1858_v31 = vmul.f32 -1.442695, %v794_v35  ;;  %v751_v30 = vpop.f32.mrb[19].mxu0  ;;  %v792_v7 = vpop.f32.mrb[19].mxu1  ;;  %v1860_v14 = vmul.f32 -1.442695, %v796_v22 }
 0x163   :  { %v1859_v15 = vmul.f32 -1.442695, %v795_v11  ;;  %v2998_v30 = vmov 0  }
 0x164   :  { %2041 = vpow2.f32 %v1858_v31 }
 0x165   :  { %2043 = vpow2.f32 %v1859_v15 }
 0x166   :  { %2045 = vtanh.f32 %v797_v23 }
 0x167   :  { %2047 = vpow2.f32 %v1860_v14 }
 0x16e   :  { %v2042_v16 = vpop.eup %2041 }
 0x16f   :  { %v807_v18 = vadd.f32 1.0, %v2042_v16  ;;  %v2044_v17 = vpop.eup %2043 }
 0x170   :  { %v808_v0 = vadd.f32 1.0, %v2044_v17  ;;  %v2046_v19 = vpop.eup %2045 }
 0x171   :  { %2049 = vrcp.f32 %v807_v18  ;;  %v2048_v20 = vpop.eup %2047 }
 0x172   :  { %2051 = vrcp.f32 %v808_v0  ;;  %v809_v53 = vadd.f32 1.0, %v2048_v20 }
 0x174   :  { %2053 = vrcp.f32 %v809_v53 }
 0x17b   :  { %v2050_v21 = vpop.eup %2049 }
 0x17c   :  { %v818_v27 = vmul.f32 %v2050_v21, %v2046_v19  ;;  %v2052_v9 = vpop.eup %2051 }
 0x17d   :  { %v817_v25 = vmul.f32 0.0, %v2052_v9 }
 0x17e   :  { %v2054_v11 = vpop.eup %2053 }
 0x17f   :  { %v2661_v7 = vadd.f32 %v818_v27, %v817_v25 }
 0x181   :  { %2055 = vtanh.f32 %v2661_v7 }
 0x18b   :  { %v2056_v22 = vpop.eup %2055 }
 0x18c   :  { %v821_v35 = vmul.f32 %v2056_v22, %v2054_v11 }
 0x18e   :  { %v829_v10 = vpack.c.bf16 %v821_v35, %v821_v35 }
 0x190   :  { %863 = vmatmul.mubr.bf16.vlgmr.msra.gmra.mrb[20].mxu0 %v829_v10  ;;  %904 = vmatmul.mubr.bf16.vlgmr.msra.gmra.mrb[20].mxu1 %v829_v10 }
 0x191   :  { %949 = vmatpush1.bf16.msra.mxu0 %v2440_v36  ;;  %990 = vmatpush1.bf16.msra.mxu1 %v2442_v37 }
 0x192   :  { %950 = vmatprep.subr.bf16.mxu0 %v2446_v38  ;;  %991 = vmatprep.subr.bf16.mxu1 %v2448_v39 }
 0x193   :  { %980 = vmatprep.mubr.bf16.mxu0 %v2998_v30  ;;  %1021 = vmatprep.mubr.bf16.mxu1 %v2998_v30 }
 0x195   :  { %951 = vmatpush1.bf16.msra.mxu0 %v2450_v40  ;;  %992 = vmatpush1.bf16.msra.mxu1 %v2454_v41 }
 0x196   :  { %952 = vmatprep.subr.bf16.mxu0 %v2458_v42  ;;  %993 = vmatprep.subr.bf16.mxu1 %v2460_v43 }
 0x199   :  { %953 = vmatpush1.bf16.msra.mxu0 %v2464_v45  ;;  %994 = vmatpush1.bf16.msra.mxu1 %v2466_v46 }
 0x19a   :  { %954 = vmatprep.subr.bf16.mxu0 %v2470_v47  ;;  %995 = vmatprep.subr.bf16.mxu1 %v2474_v48 }
 0x19d   :  { %955 = vmatpush1.bf16.msra.mxu0 %v2476_v49  ;;  %996 = vmatpush1.bf16.msra.mxu1 %v2478_v50 }
 0x19e   :  { %956 = vmatprep.subr.bf16.mxu0 %v2482_v51  ;;  %997 = vmatprep.subr.bf16.mxu1 %v2486_v52 }
 0x1a1   :  { %957 = vmatpush1.bf16.msra.mxu0 %v2490_v54  ;;  %998 = vmatpush1.bf16.msra.mxu1 %v2492_v55 }
 0x1a2   :  { %958 = vmatprep.subr.bf16.mxu0 %v2494_v56  ;;  %999 = vmatprep.subr.bf16.mxu1 %v2496_v57 }
 0x1a5   :  { %959 = vmatpush1.bf16.msra.mxu0 %v2504_v58  ;;  %1000 = vmatpush1.bf16.msra.mxu1 %v2506_v59 }
 0x1a6   :  { %960 = vmatprep.subr.bf16.mxu0 %v2510_v60  ;;  %1001 = vmatprep.subr.bf16.mxu1 %v2512_v61 }
 0x1a9   :  { %961 = vmatpush1.bf16.msra.mxu0 %v2518_v63  ;;  %1002 = vmatpush1.bf16.msra.mxu1 %v2520_v1 }
 0x1aa   :  { %962 = vmatprep.subr.bf16.mxu0 %v2524_v2  ;;  %1003 = vmatprep.subr.bf16.mxu1 %v2526_v3 }
 0x1ad   :  { %963 = vmatpush1.bf16.msra.mxu0 %v2530_v4  ;;  %1004 = vmatpush1.bf16.msra.mxu1 %v2532_v5 }
 0x1ae   :  { %1066 = vmatprep.subr.bf16.mxu0 %v2436_v33  ;;  %1107 = vmatprep.subr.bf16.mxu1 %v2438_v34 }
 0x263   :  { %v864_v13 = vpop.f32.mrb[20].mxu0  ;;  %v905_v6 = vpop.f32.mrb[20].mxu1 }
 0x264   :  { %v912_v8 = vadd.f32 %v864_v13, %v2587_v24  ;;  %v914_v12 = vadd.f32 %v905_v6, %v2590_v26  ;;  %v866_v23 = vpop.f32.mrb[21].mxu0  ;;  %v907_v31 = vpop.f32.mrb[21].mxu1 }
 0x265   :  { %v913_v15 = vadd.f32 %v866_v23, %v2592_v28  ;;  %v915_v14 = vadd.f32 %v907_v31, %v2595_v29  ;;  %v868_v16 = vpop.f32.mrb[22].mxu0  ;;  %v909_v18 = vpop.f32.mrb[22].mxu1 }
 0x266   :  { %v1861_v17 = vmul.f32 -1.442695, %v912_v8  ;;  %v869_v0 = vpop.f32.mrb[23].mxu0  ;;  %v910_v19 = vpop.f32.mrb[23].mxu1  ;;  %v1863_v21 = vmul.f32 -1.442695, %v914_v12 }
 0x267   :  { %v1862_v20 = vmul.f32 -1.442695, %v913_v15 }
 0x268   :  { %2057 = vpow2.f32 %v1861_v17  ;;  %v2999_v17 = vld [vmem:[#allocation18_spill] sm:$0xff] }
 0x269   :  { %2059 = vpow2.f32 %v1862_v20 }
 0x26a   :  { %2061 = vtanh.f32 %v915_v14 }
 0x26b   :  { %2063 = vpow2.f32 %v1863_v21 }
 0x272   :  { %v2058_v27 = vpop.eup %2057 }
 0x273   :  { %v925_v9 = vadd.f32 1.0, %v2058_v27  ;;  %v2060_v24 = vpop.eup %2059 }
 0x274   :  { %v926_v26 = vadd.f32 1.0, %v2060_v24  ;;  %v2062_v28 = vpop.eup %2061 }
 0x275   :  { %2065 = vrcp.f32 %v925_v9  ;;  %v2064_v53 = vpop.eup %2063 }
 0x276   :  { %2067 = vrcp.f32 %v926_v26  ;;  %v927_v22 = vadd.f32 1.0, %v2064_v53 }
 0x278   :  { %2069 = vrcp.f32 %v927_v22 }
 0x27f   :  { %v2066_v29 = vpop.eup %2065 }
 0x280   :  { %v936_v25 = vmul.f32 %v2066_v29, %v2062_v28  ;;  %v2068_v11 = vpop.eup %2067 }
 0x281   :  { %v935_v35 = vmul.f32 %v2068_v11, %v2661_v7 }
 0x282   :  { %v2070_v13 = vpop.eup %2069 }
 0x283   :  { %v2703_v10 = vadd.f32 %v936_v25, %v935_v35 }
 0x285   :  { %2071 = vtanh.f32 %v2703_v10 }
 0x28f   :  { %v2072_v6 = vpop.eup %2071 }
 0x290   :  { %v939_v8 = vmul.f32 %v2072_v6, %v2070_v13 }
 0x292   :  { %v947_v12 = vpack.c.bf16 %v939_v8, %v939_v8 }
 0x294   :  { %981 = vmatmul.mubr.bf16.vlgmr.msra.gmra.mrb[24].mxu0 %v947_v12  ;;  %1022 = vmatmul.mubr.bf16.vlgmr.msra.gmra.mrb[24].mxu1 %v947_v12 }
 0x295   :  { %1067 = vmatpush1.bf16.msra.mxu0 %v2440_v36  ;;  %1108 = vmatpush1.bf16.msra.mxu1 %v2442_v37 }
 0x296   :  { %1068 = vmatprep.subr.bf16.mxu0 %v2446_v38  ;;  %1109 = vmatprep.subr.bf16.mxu1 %v2448_v39 }
 0x297   :  { %1098 = vmatprep.mubr.bf16.mxu0 %v2998_v30  ;;  %1139 = vmatprep.mubr.bf16.mxu1 %v2998_v30 }
 0x299   :  { %1069 = vmatpush1.bf16.msra.mxu0 %v2450_v40  ;;  %1110 = vmatpush1.bf16.msra.mxu1 %v2454_v41 }
 0x29a   :  { %1070 = vmatprep.subr.bf16.mxu0 %v2458_v42  ;;  %1111 = vmatprep.subr.bf16.mxu1 %v2460_v43 }
 0x29d   :  { %1071 = vmatpush1.bf16.msra.mxu0 %v2464_v45  ;;  %1112 = vmatpush1.bf16.msra.mxu1 %v2466_v46 }
 0x29e   :  { %1072 = vmatprep.subr.bf16.mxu0 %v2470_v47  ;;  %1113 = vmatprep.subr.bf16.mxu1 %v2474_v48 }
 0x2a1   :  { %1073 = vmatpush1.bf16.msra.mxu0 %v2476_v49  ;;  %1114 = vmatpush1.bf16.msra.mxu1 %v2478_v50 }
 0x2a2   :  { %1074 = vmatprep.subr.bf16.mxu0 %v2482_v51  ;;  %1115 = vmatprep.subr.bf16.mxu1 %v2486_v52 }
 0x2a5   :  { %1075 = vmatpush1.bf16.msra.mxu0 %v2490_v54  ;;  %1116 = vmatpush1.bf16.msra.mxu1 %v2492_v55 }
 0x2a6   :  { %1076 = vmatprep.subr.bf16.mxu0 %v2494_v56  ;;  %1117 = vmatprep.subr.bf16.mxu1 %v2496_v57 }
 0x2a9   :  { %1077 = vmatpush1.bf16.msra.mxu0 %v2504_v58  ;;  %1118 = vmatpush1.bf16.msra.mxu1 %v2506_v59 }
 0x2aa   :  { %1078 = vmatprep.subr.bf16.mxu0 %v2510_v60  ;;  %1119 = vmatprep.subr.bf16.mxu1 %v2512_v61 }
 0x2ad   :  { %1079 = vmatpush1.bf16.msra.mxu0 %v2518_v63  ;;  %1120 = vmatpush1.bf16.msra.mxu1 %v2520_v1 }
 0x2ae   :  { %1080 = vmatprep.subr.bf16.mxu0 %v2524_v2  ;;  %1121 = vmatprep.subr.bf16.mxu1 %v2526_v3 }
 0x2b1   :  { %1081 = vmatpush1.bf16.msra.mxu0 %v2530_v4  ;;  %1122 = vmatpush1.bf16.msra.mxu1 %v2532_v5 }
 0x2b2   :  { %1184 = vmatprep.subr.bf16.mxu0 %v2436_v33  ;;  %1225 = vmatprep.subr.bf16.mxu1 %v2438_v34 }
 0x367   :  { %v982_v7 = vpop.f32.mrb[24].mxu0  ;;  %v1023_v23 = vpop.f32.mrb[24].mxu1 }
 0x368   :  { %v1030_v31 = vadd.f32 %v982_v7, %v2597_v32  ;;  %v1032_v15 = vadd.f32 %v1023_v23, %v2600_v44  ;;  %v984_v14 = vpop.f32.mrb[25].mxu0  ;;  %v1025_v16 = vpop.f32.mrb[25].mxu1 }
 0x369   :  { %v1031_v18 = vadd.f32 %v984_v14, %v2602_v62  ;;  %v1033_v0 = vadd.f32 %v1025_v16, %v2999_v17  ;;  %v986_v19 = vpop.f32.mrb[26].mxu0  ;;  %v1027_v20 = vpop.f32.mrb[26].mxu1  ;;  %v3001_v16 = vld [vmem:[#allocation20_spill] sm:$0xff] }
 0x36a   :  { %v1864_v21 = vmul.f32 -1.442695, %v1030_v31  ;;  %v987_v27 = vpop.f32.mrb[27].mxu0  ;;  %v1028_v9 = vpop.f32.mrb[27].mxu1  ;;  %v1866_v26 = vmul.f32 -1.442695, %v1032_v15 }
 0x36b   :  { %v1865_v24 = vmul.f32 -1.442695, %v1031_v18  ;;  %v3000_v15 = vld [vmem:[#allocation19_spill] sm:$0xff]  ;;  %v3002_v19 = vld [vmem:[#allocation21_spill] sm:$0xff] }
 0x36c   :  { %2073 = vpow2.f32 %v1864_v21  ;;  %v3003_v21 = vld [vmem:[#allocation22_spill] sm:$0xff] }
 0x36d   :  { %2075 = vpow2.f32 %v1865_v24 }
 0x36e   :  { %2077 = vtanh.f32 %v1033_v0 }
 0x36f   :  { %2079 = vpow2.f32 %v1866_v26 }
 0x376   :  { %v2074_v28 = vpop.eup %2073 }
 0x377   :  { %v1043_v53 = vadd.f32 1.0, %v2074_v28  ;;  %v2076_v32 = vpop.eup %2075 }
 0x378   :  { %v1044_v44 = vadd.f32 1.0, %v2076_v32  ;;  %v2078_v62 = vpop.eup %2077 }
 0x379   :  { %2081 = vrcp.f32 %v1043_v53  ;;  %v2080_v29 = vpop.eup %2079 }
 0x37a   :  { %2083 = vrcp.f32 %v1044_v44  ;;  %v1045_v35 = vadd.f32 1.0, %v2080_v29 }
 0x37c   :  { %2085 = vrcp.f32 %v1045_v35 }
 0x383   :  { %v2082_v25 = vpop.eup %2081 }
 0x384   :  { %v1054_v11 = vmul.f32 %v2082_v25, %v2078_v62  ;;  %v2084_v22 = vpop.eup %2083 }
 0x385   :  { %v1053_v13 = vmul.f32 %v2084_v22, %v2703_v10 }
 0x386   :  { %v2086_v8 = vpop.eup %2085 }
 0x387   :  { %v2745_v6 = vadd.f32 %v1054_v11, %v1053_v13 }
 0x389   :  { %2087 = vtanh.f32 %v2745_v6 }
 0x393   :  { %v2088_v12 = vpop.eup %2087 }
 0x394   :  { %v1057_v7 = vmul.f32 %v2088_v12, %v2086_v8 }
 0x396   :  { %v1065_v23 = vpack.c.bf16 %v1057_v7, %v1057_v7 }
 0x398   :  { %1099 = vmatmul.mubr.bf16.vlgmr.msra.gmra.mrb[28].mxu0 %v1065_v23  ;;  %1140 = vmatmul.mubr.bf16.vlgmr.msra.gmra.mrb[28].mxu1 %v1065_v23 }
 0x399   :  { %1185 = vmatpush1.bf16.msra.mxu0 %v2440_v36  ;;  %1226 = vmatpush1.bf16.msra.mxu1 %v2442_v37 }
 0x39a   :  { %1186 = vmatprep.subr.bf16.mxu0 %v2446_v38  ;;  %1227 = vmatprep.subr.bf16.mxu1 %v2448_v39 }
 0x39b   :  { %1216 = vmatprep.mubr.bf16.mxu0 %v2998_v30  ;;  %1257 = vmatprep.mubr.bf16.mxu1 %v2998_v30 }
 0x39d   :  { %1187 = vmatpush1.bf16.msra.mxu0 %v2450_v40  ;;  %1228 = vmatpush1.bf16.msra.mxu1 %v2454_v41 }
 0x39e   :  { %1188 = vmatprep.subr.bf16.mxu0 %v2458_v42  ;;  %1229 = vmatprep.subr.bf16.mxu1 %v2460_v43 }
 0x3a1   :  { %1189 = vmatpush1.bf16.msra.mxu0 %v2464_v45  ;;  %1230 = vmatpush1.bf16.msra.mxu1 %v2466_v46 }
 0x3a2   :  { %1190 = vmatprep.subr.bf16.mxu0 %v2470_v47  ;;  %1231 = vmatprep.subr.bf16.mxu1 %v2474_v48 }
 0x3a5   :  { %1191 = vmatpush1.bf16.msra.mxu0 %v2476_v49  ;;  %1232 = vmatpush1.bf16.msra.mxu1 %v2478_v50 }
 0x3a6   :  { %1192 = vmatprep.subr.bf16.mxu0 %v2482_v51  ;;  %1233 = vmatprep.subr.bf16.mxu1 %v2486_v52 }
 0x3a9   :  { %1193 = vmatpush1.bf16.msra.mxu0 %v2490_v54  ;;  %1234 = vmatpush1.bf16.msra.mxu1 %v2492_v55 }
 0x3aa   :  { %1194 = vmatprep.subr.bf16.mxu0 %v2494_v56  ;;  %1235 = vmatprep.subr.bf16.mxu1 %v2496_v57 }
 0x3ad   :  { %1195 = vmatpush1.bf16.msra.mxu0 %v2504_v58  ;;  %1236 = vmatpush1.bf16.msra.mxu1 %v2506_v59 }
 0x3ae   :  { %1196 = vmatprep.subr.bf16.mxu0 %v2510_v60  ;;  %1237 = vmatprep.subr.bf16.mxu1 %v2512_v61 }
 0x3b1   :  { %1197 = vmatpush1.bf16.msra.mxu0 %v2518_v63  ;;  %1238 = vmatpush1.bf16.msra.mxu1 %v2520_v1 }
 0x3b2   :  { %1198 = vmatprep.subr.bf16.mxu0 %v2524_v2  ;;  %1239 = vmatprep.subr.bf16.mxu1 %v2526_v3 }
 0x3b5   :  { %1199 = vmatpush1.bf16.msra.mxu0 %v2530_v4  ;;  %1240 = vmatpush1.bf16.msra.mxu1 %v2532_v5 }
 0x3b6   :  { %1302 = vmatprep.subr.bf16.mxu0 %v2436_v33  ;;  %1343 = vmatprep.subr.bf16.mxu1 %v2438_v34 }
 0x46b   :  { %v1100_v10 = vpop.f32.mrb[28].mxu0  ;;  %v1141_v31 = vpop.f32.mrb[28].mxu1 }
 0x46c   :  { %v1148_v14 = vadd.f32 %v1100_v10, %v3000_v15  ;;  %v1150_v18 = vadd.f32 %v1141_v31, %v3001_v16  ;;  %v1102_v17 = vpop.f32.mrb[29].mxu0  ;;  %v1143_v0 = vpop.f32.mrb[29].mxu1 }
 0x46d   :  { %v1149_v20 = vadd.f32 %v1102_v17, %v3002_v19  ;;  %v1151_v27 = vadd.f32 %v1143_v0, %v3003_v21  ;;  %v1104_v9 = vpop.f32.mrb[30].mxu0  ;;  %v1145_v24 = vpop.f32.mrb[30].mxu1 }
 0x46e   :  { %v1867_v26 = vmul.f32 -1.442695, %v1148_v14  ;;  %v1105_v28 = vpop.f32.mrb[31].mxu0  ;;  %v1146_v53 = vpop.f32.mrb[31].mxu1  ;;  %v1869_v34 = vmul.f32 -1.442695, %v1150_v18 }
 0x46f   :  { %v1868_v33 = vmul.f32 -1.442695, %v1149_v20 }
 0x470   :  { %2089 = vpow2.f32 %v1867_v26 }
 0x471   :  { %2091 = vpow2.f32 %v1868_v33 }
 0x472   :  { %2093 = vtanh.f32 %v1151_v27 }
 0x473   :  { %2095 = vpow2.f32 %v1869_v34 }
 0x47a   :  { %v2090_v32 = vpop.eup %2089 }
 0x47b   :  { %v1161_v44 = vadd.f32 1.0, %v2090_v32  ;;  %v2092_v62 = vpop.eup %2091  ;;  %v2836_v32 = vld [vmem:[#allocation10] ss:$16 sps:$4 sm:$0xff]  }
 0x47c   :  { %v1162_v29 = vadd.f32 1.0, %v2092_v62  ;;  %v2094_v25 = vpop.eup %2093  ;;  %v2842_v62 = vld [vmem:[#allocation10 + $0x24] ss:$16 sps:$4 sm:$0xff]  }
 0x47d   :  { %2097 = vrcp.f32 %v1161_v44  ;;  %v2096_v11 = vpop.eup %2095  ;;  %v2839_v44 = vld [vmem:[#allocation10 + $0x8] ss:$16 sps:$4 sm:$0xff]  }
 0x47e   :  { %2099 = vrcp.f32 %v1162_v29  ;;  %v1163_v8 = vadd.f32 1.0, %v2096_v11  ;;  %v2845_v29 = vld [vmem:[#allocation10 + $0x2c] ss:$16 sps:$4 sm:$0xff]   ;;  %v2853_v11 = vld [vmem:[#allocation10 + $0x28] ss:$16 sps:$4 sm:$0xff]  }
 0x480   :  { %2101 = vrcp.f32 %v1163_v8  ;;  %v2865_v8 = vld [vmem:[#allocation10 + $0x48] ss:$16 sps:$4 sm:$0xff]  }
 0x487   :  { %v2098_v22 = vpop.eup %2097 }
 0x488   :  { %v1172_v35 = vmul.f32 %v2098_v22, %v2094_v25  ;;  %v2100_v13 = vpop.eup %2099  ;;  %v2850_v25 = vld [vmem:[#allocation10 + $0x20] ss:$16 sps:$4 sm:$0xff]   ;;  %v2856_v22 = vld [vmem:[#allocation10 + $0x44] ss:$16 sps:$4 sm:$0xff]  }
 0x489   :  { %v1171_v12 = vmul.f32 %v2100_v13, %v2745_v6  ;;  %v2862_v13 = vld [vmem:[#allocation10 + $0x40] ss:$16 sps:$4 sm:$0xff]  }
 0x48a   :  { %v2102_v23 = vpop.eup %2101 }
 0x48b   :  { %v2787_v7 = vadd.f32 %v1172_v35, %v1171_v12  ;;  %v2859_v35 = vld [vmem:[#allocation10 + $0x4c] ss:$16 sps:$4 sm:$0xff]   ;;  %v2868_v12 = vld [vmem:[#allocation10 + $0x64] ss:$16 sps:$4 sm:$0xff]  }
 0x48d   :  { %2103 = vtanh.f32 %v2787_v7 }
 0x497   :  { %v2104_v10 = vpop.eup %2103 }
 0x498   :  { %v1175_v31 = vmul.f32 %v2104_v10, %v2102_v23  ;;  %v2874_v23 = vld [vmem:[#allocation10 + $0x60] ss:$16 sps:$4 sm:$0xff]   ;;  %v2877_v10 = vld [vmem:[#allocation10 + $0x68] ss:$16 sps:$4 sm:$0xff]  }
 0x49a   :  { %v1183_v15 = vpack.c.bf16 %v1175_v31, %v1175_v31  ;;  %v2880_v31 = vld [vmem:[#allocation10 + $0x84] ss:$16 sps:$4 sm:$0xff]  }
 0x49c   :  { %1217 = vmatmul.mubr.bf16.vlgmr.msra.gmra.mrb[32].mxu0 %v1183_v15  ;;  %1258 = vmatmul.mubr.bf16.vlgmr.msra.gmra.mrb[32].mxu1 %v1183_v15  ;;  %v2883_v15 = vld [vmem:[#allocation10 + $0x8c] ss:$16 sps:$4 sm:$0xff]  }
 0x49d   :  { %1303 = vmatpush1.bf16.msra.mxu0 %v2440_v36  ;;  %1344 = vmatpush1.bf16.msra.mxu1 %v2442_v37  ;;  %v2822_v36 = vld [vmem:[#allocation10 + $0x4] ss:$16 sps:$4 sm:$0xff]   ;;  %v2825_v37 = vld [vmem:[#allocation10 + $0xc] ss:$16 sps:$4 sm:$0xff]  }
 0x49e   :  { %1304 = vmatprep.subr.bf16.mxu0 %v2446_v38  ;;  %1345 = vmatprep.subr.bf16.mxu1 %v2448_v39 }
 0x49f   :  { %1334 = vmatprep.mubr.bf16.mxu0 %v2998_v30  ;;  %1375 = vmatprep.mubr.bf16.mxu1 %v2998_v30 }
 0x4a1   :  { %1305 = vmatpush1.bf16.msra.mxu0 %v2450_v40  ;;  %1346 = vmatpush1.bf16.msra.mxu1 %v2454_v41  ;;  %v3004_v40 = vld [vmem:[#allocation23_spill] sm:$0xff] }
 0x4a2   :  { %1306 = vmatprep.subr.bf16.mxu0 %v2458_v42  ;;  %1347 = vmatprep.subr.bf16.mxu1 %v2460_v43  ;;  %v3005_v42 = vld [vmem:[#allocation24_spill] sm:$0xff] }
 0x4a5   :  { %1307 = vmatpush1.bf16.msra.mxu0 %v2464_v45  ;;  %1348 = vmatpush1.bf16.msra.mxu1 %v2466_v46 }
 0x4a6   :  { %1308 = vmatprep.subr.bf16.mxu0 %v2470_v47  ;;  %1349 = vmatprep.subr.bf16.mxu1 %v2474_v48  ;;  %v3006_v47 = vld [vmem:[#allocation25_spill] sm:$0xff] }
 0x4a9   :  { %1309 = vmatpush1.bf16.msra.mxu0 %v2476_v49  ;;  %1350 = vmatpush1.bf16.msra.mxu1 %v2478_v50  ;;  %v3007_v49 = vld [vmem:[#allocation26_spill] sm:$0xff] }
 0x4aa   :  { %1310 = vmatprep.subr.bf16.mxu0 %v2482_v51  ;;  %1351 = vmatprep.subr.bf16.mxu1 %v2486_v52 }
 0x4ad   :  { %1311 = vmatpush1.bf16.msra.mxu0 %v2490_v54  ;;  %1352 = vmatpush1.bf16.msra.mxu1 %v2492_v55 }
 0x4ae   :  { %1312 = vmatprep.subr.bf16.mxu0 %v2494_v56  ;;  %1353 = vmatprep.subr.bf16.mxu1 %v2496_v57 }
 0x4b1   :  { %1313 = vmatpush1.bf16.msra.mxu0 %v2504_v58  ;;  %1354 = vmatpush1.bf16.msra.mxu1 %v2506_v59 }
 0x4b2   :  { %1314 = vmatprep.subr.bf16.mxu0 %v2510_v60  ;;  %1355 = vmatprep.subr.bf16.mxu1 %v2512_v61 }
 0x4b5   :  { %1315 = vmatpush1.bf16.msra.mxu0 %v2518_v63  ;;  %1356 = vmatpush1.bf16.msra.mxu1 %v2520_v1 }
 0x4b6   :  { %1316 = vmatprep.subr.bf16.mxu0 %v2524_v2  ;;  %1357 = vmatprep.subr.bf16.mxu1 %v2526_v3 }
 0x4b9   :  { %1317 = vmatpush1.bf16.msra.mxu0 %v2530_v4  ;;  %1358 = vmatpush1.bf16.msra.mxu1 %v2532_v5 }
 0x4ba   :  { %1420 = vmatprep.subr.bf16.mxu0 %v2822_v36  ;;  %1461 = vmatprep.subr.bf16.mxu1 %v2825_v37 }
 0x56f   :  { %v1218_v38 = vpop.f32.mrb[32].mxu0  ;;  %v1259_v39 = vpop.f32.mrb[32].mxu1 }
 0x570   :  { %v1266_v41 = vadd.f32 %v1218_v38, %v3004_v40  ;;  %v1268_v43 = vadd.f32 %v1259_v39, %v3005_v42  ;;  %v1220_v45 = vpop.f32.mrb[33].mxu0  ;;  %v1261_v46 = vpop.f32.mrb[33].mxu1  ;;  %v2886_v38 = vld [vmem:[#allocation10 + $0x80] ss:$16 sps:$4 sm:$0xff]   ;;  %v2889_v39 = vld [vmem:[#allocation10 + $0x88] ss:$16 sps:$4 sm:$0xff]  }
 0x571   :  { %v1267_v48 = vadd.f32 %v1220_v45, %v3006_v47  ;;  %v1269_v50 = vadd.f32 %v1261_v46, %v3007_v49  ;;  %v1222_v51 = vpop.f32.mrb[34].mxu0  ;;  %v1263_v52 = vpop.f32.mrb[34].mxu1  ;;  %v2892_v40 = vld [vmem:[#allocation10 + $0xa4] ss:$16 sps:$4 sm:$0xff]   ;;  %v3009_v42 = vld [vmem:[#allocation28_spill] sm:$0xff]  ;;  %v3011_v46 = vld [vmem:[#allocation30_spill] sm:$0xff] }
 0x572   :  { %v1870_v54 = vmul.f32 -1.442695, %v1266_v41  ;;  %v1223_v55 = vpop.f32.mrb[35].mxu0  ;;  %v1264_v56 = vpop.f32.mrb[35].mxu1  ;;  %v1872_v6 = vmul.f32 -1.442695, %v1268_v43 }
 0x573   :  { %v1871_v57 = vmul.f32 -1.442695, %v1267_v48  ;;  %v2895_v41 = vld [vmem:[#allocation10 + $0xac] ss:$16 sps:$4 sm:$0xff]   ;;  %v3010_v45 = vld [vmem:[#allocation29_spill] sm:$0xff] }
 0x574   :  { %2105 = vpow2.f32 %v1870_v54 }
 0x575   :  { %2107 = vpow2.f32 %v1871_v57 }
 0x576   :  { %2109 = vtanh.f32 %v1269_v50 }
 0x577   :  { %2111 = vpow2.f32 %v1872_v6 }
 0x57e   :  { %v2106_v14 = vpop.eup %2105 }
 0x57f   :  { %v1279_v16 = vadd.f32 1.0, %v2106_v14  ;;  %v2108_v18 = vpop.eup %2107 }
 0x580   :  { %v1280_v17 = vadd.f32 1.0, %v2108_v18  ;;  %v2110_v0 = vpop.eup %2109 }
 0x581   :  { %2113 = vrcp.f32 %v1279_v16  ;;  %v2112_v19 = vpop.eup %2111 }
 0x582   :  { %2115 = vrcp.f32 %v1280_v17  ;;  %v1281_v9 = vadd.f32 1.0, %v2112_v19 }
 0x584   :  { %2117 = vrcp.f32 %v1281_v9  ;;  %v2193_v9 = vld [vmem:[#allocation10 + $0xc4] ss:$16 sps:$4 sm:$0xff]  }
 0x58b   :  { %v2114_v20 = vpop.eup %2113 }
 0x58c   :  { %v1290_v21 = vmul.f32 %v2114_v20, %v2110_v0  ;;  %v2116_v27 = vpop.eup %2115 }
 0x58d   :  { %v1289_v24 = vmul.f32 %v2116_v27, %v2787_v7  ;;  %v2871_v7 = vld [vmem:[#allocation10 + $0x6c] ss:$16 sps:$4 sm:$0xff]   ;;  %v2192_v27 = vld [vmem:[#allocation10 + $0xa8] ss:$16 sps:$4 sm:$0xff]  }
 0x58e   :  { %v2118_v28 = vpop.eup %2117 }
 0x58f   :  { %v2833_v26 = vadd.f32 %v1290_v21, %v1289_v24  ;;  %v2194_v24 = vld [vmem:[#allocation10 + $0xcc] ss:$16 sps:$4 sm:$0xff]  }
 0x591   :  { %2119 = vtanh.f32 %v2833_v26 }
 0x59b   :  { %v2120_v53 = vpop.eup %2119 }
 0x59c   :  { %v1293_v33 = vmul.f32 %v2120_v53, %v2118_v28  ;;  %v2196_v28 = vld [vmem:[#allocation10 + $0xc8] ss:$16 sps:$4 sm:$0xff]   ;;  %v2197_v53 = vld [vmem:[#allocation10 + $0xe4] ss:$16 sps:$4 sm:$0xff]  }
 0x59e   :  { %v1301_v34 = vpack.c.bf16 %v1293_v33, %v1293_v33  ;;  %v2198_v33 = vld [vmem:[#allocation10 + $0xec] ss:$16 sps:$4 sm:$0xff]  }
 0x5a0   :  { %1335 = vmatmul.mubr.bf16.vlgmr.msra.gmra.mrb[36].mxu0 %v1301_v34  ;;  %1376 = vmatmul.mubr.bf16.vlgmr.msra.gmra.mrb[36].mxu1 %v1301_v34  ;;  %v2199_v34 = vld [vmem:[#allocation10 + $0xe0] ss:$16 sps:$4 sm:$0xff]  }
 0x5a1   :  { %1421 = vmatpush1.bf16.msra.mxu0 %v2836_v32  ;;  %1462 = vmatpush1.bf16.msra.mxu1 %v2839_v44 }
 0x5a2   :  { %1422 = vmatprep.subr.bf16.mxu0 %v2842_v62  ;;  %1463 = vmatprep.subr.bf16.mxu1 %v2845_v29 }
 0x5a3   :  { %1452 = vmatprep.mubr.bf16.mxu0 %v2998_v30  ;;  %1493 = vmatprep.mubr.bf16.mxu1 %v2998_v30 }
 0x5a5   :  { %1423 = vmatpush1.bf16.msra.mxu0 %v2850_v25  ;;  %1464 = vmatpush1.bf16.msra.mxu1 %v2853_v11 }
 0x5a6   :  { %1424 = vmatprep.subr.bf16.mxu0 %v2856_v22  ;;  %1465 = vmatprep.subr.bf16.mxu1 %v2859_v35 }
 0x5a9   :  { %1425 = vmatpush1.bf16.msra.mxu0 %v2862_v13  ;;  %1466 = vmatpush1.bf16.msra.mxu1 %v2865_v8 }
 0x5aa   :  { %1426 = vmatprep.subr.bf16.mxu0 %v2868_v12  ;;  %1467 = vmatprep.subr.bf16.mxu1 %v2871_v7 }
 0x5ad   :  { %1427 = vmatpush1.bf16.msra.mxu0 %v2874_v23  ;;  %1468 = vmatpush1.bf16.msra.mxu1 %v2877_v10 }
 0x5ae   :  { %1428 = vmatprep.subr.bf16.mxu0 %v2880_v31  ;;  %1469 = vmatprep.subr.bf16.mxu1 %v2883_v15 }
 0x5b1   :  { %1429 = vmatpush1.bf16.msra.mxu0 %v2886_v38  ;;  %1470 = vmatpush1.bf16.msra.mxu1 %v2889_v39 }
 0x5b2   :  { %1430 = vmatprep.subr.bf16.mxu0 %v2892_v40  ;;  %1471 = vmatprep.subr.bf16.mxu1 %v2895_v41 }
 0x5b5   :  { %1431 = vmatpush1.bf16.msra.mxu0 %v2504_v58  ;;  %1472 = vmatpush1.bf16.msra.mxu1 %v2506_v59 }
 0x5b6   :  { %1432 = vmatprep.subr.bf16.mxu0 %v2510_v60  ;;  %1473 = vmatprep.subr.bf16.mxu1 %v2512_v61  ;;  %v3008_v60 = vld [vmem:[#allocation27_spill] sm:$0xff] }
 0x5b9   :  { %1433 = vmatpush1.bf16.msra.mxu0 %v2518_v63  ;;  %1474 = vmatpush1.bf16.msra.mxu1 %v2520_v1 }
 0x5ba   :  { %1434 = vmatprep.subr.bf16.mxu0 %v2524_v2  ;;  %1475 = vmatprep.subr.bf16.mxu1 %v2526_v3 }
 0x5bd   :  { %1435 = vmatpush1.bf16.msra.mxu0 %v2530_v4  ;;  %1476 = vmatpush1.bf16.msra.mxu1 %v2532_v5 }
 0x5be   :  { %1538 = vmatprep.subr.bf16.mxu0 %v2822_v36  ;;  %1579 = vmatprep.subr.bf16.mxu1 %v2825_v37 }
 0x673   :  { %v1336_v58 = vpop.f32.mrb[36].mxu0  ;;  %v1377_v59 = vpop.f32.mrb[36].mxu1 }
 0x674   :  { %v1384_v61 = vadd.f32 %v1336_v58, %v3008_v60  ;;  %v1386_v63 = vadd.f32 %v1377_v59, %v3009_v42  ;;  %v1338_v43 = vpop.f32.mrb[37].mxu0  ;;  %v1379_v1 = vpop.f32.mrb[37].mxu1 }
 0x675   :  { %v1385_v2 = vadd.f32 %v1338_v43, %v3010_v45  ;;  %v1387_v3 = vadd.f32 %v1379_v1, %v3011_v46  ;;  %v1340_v47 = vpop.f32.mrb[38].mxu0  ;;  %v1381_v4 = vpop.f32.mrb[38].mxu1 }
 0x676   :  { %v1873_v48 = vmul.f32 -1.442695, %v1384_v61  ;;  %v1341_v5 = vpop.f32.mrb[39].mxu0  ;;  %v1382_v49 = vpop.f32.mrb[39].mxu1  ;;  %v1875_v37 = vmul.f32 -1.442695, %v1386_v63 }
 0x677   :  { %v1874_v36 = vmul.f32 -1.442695, %v1385_v2  ;;  %v2033_v49 = vld [vmem:[#allocation11] sm:$0xff]  }
 0x678   :  { %2121 = vpow2.f32 %v1873_v48 }
 0x679   :  { %2123 = vpow2.f32 %v1874_v36  ;;  %v2329_v36 = vmov 0.0  }
 0x67a   :  { %2125 = vtanh.f32 %v1387_v3 }
 0x67b   :  { %2127 = vpow2.f32 %v1875_v37  ;;  %v2034_v37 = vld [vmem:[#allocation11 + $0x8] sm:$0xff]  }
 0x682   :  { %v2122_v50 = vpop.eup %2121 }
 0x683   :  { %v1397_v51 = vadd.f32 1.0, %v2122_v50  ;;  %v2124_v52 = vpop.eup %2123  ;;  %v2035_v50 = vld [vmem:[#allocation11 + $0x10] sm:$0xff]  }
 0x684   :  { %v1398_v54 = vadd.f32 1.0, %v2124_v52  ;;  %v2126_v55 = vpop.eup %2125  ;;  %v2037_v52 = vld [vmem:[#allocation11 + $0x20] sm:$0xff]  }
 0x685   :  { %2129 = vrcp.f32 %v1397_v51  ;;  %v2128_v56 = vpop.eup %2127  ;;  %v2036_v51 = vld [vmem:[#allocation11 + $0x18] sm:$0xff]  }
 0x686   :  { %2131 = vrcp.f32 %v1398_v54  ;;  %v1399_v16 = vadd.f32 1.0, %v2128_v56  ;;  %v2038_v54 = vld [vmem:[#allocation11 + $0x28] sm:$0xff]   ;;  %v2040_v56 = vld [vmem:[#allocation11 + $0x38] sm:$0xff]  }
 0x688   :  { %2133 = vrcp.f32 %v1399_v16 }
 0x68f   :  { %v2130_v57 = vpop.eup %2129 }
 0x690   :  { %v1408_v6 = vmul.f32 %v2130_v57, %v2126_v55  ;;  %v2132_v14 = vpop.eup %2131  ;;  %v2039_v55 = vld [vmem:[#allocation11 + $0x30] sm:$0xff]  }
 0x691   :  { %v1407_v18 = vmul.f32 %v2132_v14, %v2833_v26  ;;  %v2195_v26 = vld [vmem:[#allocation10 + $0xc0] ss:$16 sps:$4 sm:$0xff]  }
 0x692   :  { %v2134_v0 = vpop.eup %2133  ;;  %v3016_v14 = vld [vmem:[#allocation35_spill] sm:$0xff] }
 0x693   :  { %v2915_v17 = vadd.f32 %v1408_v6, %v1407_v18  ;;  %v3017_v18 = vld [vmem:[#allocation36_spill] sm:$0xff] }
 0x695   :  { %2135 = vtanh.f32 %v2915_v17 }
 0x69f   :  { %v2136_v19 = vpop.eup %2135 }
 0x6a0   :  { %v1411_v20 = vmul.f32 %v2136_v19, %v2134_v0 }
 0x6a2   :  { %v1419_v21 = vpack.c.bf16 %v1411_v20, %v1411_v20  ;;  %v3018_v20 = vld [vmem:[#allocation37_spill] sm:$0xff] }
 0x6a4   :  { %1453 = vmatmul.mubr.bf16.vlgmr.msra.gmra.mrb[40].mxu0 %v1419_v21  ;;  %1494 = vmatmul.mubr.bf16.vlgmr.msra.gmra.mrb[40].mxu1 %v1419_v21 }
 0x6a5   :  { %1539 = vmatpush1.bf16.msra.mxu0 %v2836_v32  ;;  %1580 = vmatpush1.bf16.msra.mxu1 %v2839_v44  ;;  %v2200_v32 = vld [vmem:[#allocation10 + $0xe8] ss:$16 sps:$4 sm:$0xff]  }
 0x6a6   :  { %1540 = vmatprep.subr.bf16.mxu0 %v2842_v62  ;;  %1581 = vmatprep.subr.bf16.mxu1 %v2845_v29  ;;  %v3012_v29 = vld [vmem:[#allocation31_spill] sm:$0xff] }
 0x6a7   :  { %1570 = vmatprep.mubr.bf16.mxu0 %v2998_v30  ;;  %1611 = vmatprep.mubr.bf16.mxu1 %v2998_v30  ;;  %v2191_v30 = vld [vmem:[#allocation10 + $0xa0] ss:$16 sps:$4 sm:$0xff]  }
 0x6a9   :  { %1541 = vmatpush1.bf16.msra.mxu0 %v2850_v25  ;;  %1582 = vmatpush1.bf16.msra.mxu1 %v2853_v11  ;;  %v3013_v11 = vld [vmem:[#allocation32_spill] sm:$0xff] }
 0x6aa   :  { %1542 = vmatprep.subr.bf16.mxu0 %v2856_v22  ;;  %1583 = vmatprep.subr.bf16.mxu1 %v2859_v35 }
 0x6ad   :  { %1543 = vmatpush1.bf16.msra.mxu0 %v2862_v13  ;;  %1584 = vmatpush1.bf16.msra.mxu1 %v2865_v8  ;;  %v3014_v8 = vld [vmem:[#allocation33_spill] sm:$0xff] }
 0x6ae   :  { %1544 = vmatprep.subr.bf16.mxu0 %v2868_v12  ;;  %1585 = vmatprep.subr.bf16.mxu1 %v2871_v7  ;;  %v3015_v7 = vld [vmem:[#allocation34_spill] sm:$0xff] }
 0x6b1   :  { %1545 = vmatpush1.bf16.msra.mxu0 %v2874_v23  ;;  %1586 = vmatpush1.bf16.msra.mxu1 %v2877_v10 }
 0x6b2   :  { %1546 = vmatprep.subr.bf16.mxu0 %v2880_v31  ;;  %1587 = vmatprep.subr.bf16.mxu1 %v2883_v15 }
 0x6b5   :  { %1547 = vmatpush1.bf16.msra.mxu0 %v2886_v38  ;;  %1588 = vmatpush1.bf16.msra.mxu1 %v2889_v39 }
 0x6b6   :  { %1548 = vmatprep.subr.bf16.mxu0 %v2892_v40  ;;  %1589 = vmatprep.subr.bf16.mxu1 %v2895_v41 }
 0x6b9   :  { %1549 = vmatpush1.bf16.msra.mxu0 %v2191_v30  ;;  %1590 = vmatpush1.bf16.msra.mxu1 %v2192_v27  ;;  %v3019_v30 = vld [vmem:[#allocation38_spill] sm:$0xff] }
 0x6ba   :  { %1550 = vmatprep.subr.bf16.mxu0 %v2193_v9  ;;  %1591 = vmatprep.subr.bf16.mxu1 %v2194_v24 }
 0x6bd   :  { %1551 = vmatpush1.bf16.msra.mxu0 %v2195_v26  ;;  %1592 = vmatpush1.bf16.msra.mxu1 %v2196_v28 }
 0x6be   :  { %1552 = vmatprep.subr.bf16.mxu0 %v2197_v53  ;;  %1593 = vmatprep.subr.bf16.mxu1 %v2198_v33 }
 0x6c1   :  { %1553 = vmatpush1.bf16.msra.mxu0 %v2199_v34  ;;  %1594 = vmatpush1.bf16.msra.mxu1 %v2200_v32 }
 0x6c2   :  { %1900 = vmatprep.subr.bf16.mxu0 %v2329_v36 }
 0x777   :  { %v1454_v44 = vpop.f32.mrb[40].mxu0  ;;  %v1495_v62 = vpop.f32.mrb[40].mxu1 }
 0x778   :  { %v1502_v25 = vadd.f32 %v1454_v44, %v3012_v29  ;;  %v1504_v22 = vadd.f32 %v1495_v62, %v3013_v11  ;;  %v1456_v35 = vpop.f32.mrb[41].mxu0  ;;  %v1497_v13 = vpop.f32.mrb[41].mxu1 }
 0x779   :  { %v1503_v12 = vadd.f32 %v1456_v35, %v3014_v8  ;;  %v1505_v23 = vadd.f32 %v1497_v13, %v3015_v7  ;;  %v1458_v10 = vpop.f32.mrb[42].mxu0  ;;  %v1499_v31 = vpop.f32.mrb[42].mxu1 }
 0x77a   :  { %v1876_v15 = vmul.f32 -1.442695, %v1502_v25  ;;  %v1459_v38 = vpop.f32.mrb[43].mxu0  ;;  %v1500_v39 = vpop.f32.mrb[43].mxu1  ;;  %v1878_v41 = vmul.f32 -1.442695, %v1504_v22 }
 0x77b   :  { %v1877_v40 = vmul.f32 -1.442695, %v1503_v12  ;;  %v1882_v38 = vld [vmem:[%s2973_s5] ss:$0 sm:$0xff] }
 0x77c   :  { %2137 = vpow2.f32 %v1876_v15 }
 0x77d   :  { %2139 = vpow2.f32 %v1877_v40 }
 0x77e   :  { %2141 = vtanh.f32 %v1505_v23 }
 0x77f   :  { %2143 = vpow2.f32 %v1878_v41 }
 0x786   :  { %v2138_v58 = vpop.eup %2137 }
 0x787   :  { %v1515_v59 = vadd.f32 1.0, %v2138_v58  ;;  %v2140_v60 = vpop.eup %2139 }
 0x788   :  { %v1516_v61 = vadd.f32 1.0, %v2140_v60  ;;  %v2142_v42 = vpop.eup %2141 }
 0x789   :  { %2145 = vrcp.f32 %v1515_v59  ;;  %v2144_v63 = vpop.eup %2143 }
 0x78a   :  { %2147 = vrcp.f32 %v1516_v61  ;;  %v1517_v2 = vadd.f32 1.0, %v2144_v63 }
 0x78c   :  { %2149 = vrcp.f32 %v1517_v2 }
 0x793   :  { %v2146_v43 = vpop.eup %2145 }
 0x794   :  { %v1526_v1 = vmul.f32 %v2146_v43, %v2142_v42  ;;  %v2148_v45 = vpop.eup %2147 }
 0x795   :  { %v1525_v46 = vmul.f32 %v2148_v45, %v2915_v17 }
 0x796   :  { %v2150_v47 = vpop.eup %2149 }
 0x797   :  { %v2945_v3 = vadd.f32 %v1526_v1, %v1525_v46 }
 0x799   :  { %2151 = vtanh.f32 %v2945_v3 }
 0x7a3   :  { %v2152_v4 = vpop.eup %2151 }
 0x7a4   :  { %v1529_v48 = vmul.f32 %v2152_v4, %v2150_v47 }
 0x7a6   :  { %v1537_v5 = vpack.c.bf16 %v1529_v48, %v1529_v48 }
 0x7a8   :  { %1571 = vmatmul.mubr.bf16.vlgmr.msra.gmra.mrb[44].mxu0 %v1537_v5  ;;  %1612 = vmatmul.mubr.bf16.vlgmr.msra.gmra.mrb[44].mxu1 %v1537_v5 }
 0x7a9   :  { %1901 = vmatpush3.bf16.msra.mxu0 %v2033_v49  ;;  %1916 = vmatprep.mubr.msk.bf16.mxu0 %vm2330_vm0, %v2329_v36 }
 0x7aa   :  { %1902 = vmatprep.subr.bf16.mxu0 %v2329_v36 }
 0x7ad   :  { %1903 = vmatpush3.bf16.msra.mxu0 %v2034_v37 }
 0x7ae   :  { %1904 = vmatprep.subr.bf16.mxu0 %v2329_v36 }
 0x7b1   :  { %1905 = vmatpush3.bf16.msra.mxu0 %v2035_v50 }
 0x7b2   :  { %1906 = vmatprep.subr.bf16.mxu0 %v2329_v36 }
 0x7b5   :  { %1907 = vmatpush3.bf16.msra.mxu0 %v2036_v51 }
 0x7b6   :  { %1908 = vmatprep.subr.bf16.mxu0 %v2329_v36 }
 0x7b9   :  { %1909 = vmatpush3.bf16.msra.mxu0 %v2037_v52 }
 0x7ba   :  { %1910 = vmatprep.subr.bf16.mxu0 %v2329_v36 }
 0x7bd   :  { %1911 = vmatpush3.bf16.msra.mxu0 %v2038_v54 }
 0x7be   :  { %1912 = vmatprep.subr.bf16.mxu0 %v2329_v36 }
 0x7c1   :  { %1913 = vmatpush3.bf16.msra.mxu0 %v2039_v55 }
 0x7c2   :  { %1914 = vmatprep.subr.bf16.mxu0 %v2329_v36 }
 0x7c5   :  { %1915 = vmatpush3.bf16.msra.mxu0 %v2040_v56 }
 0x87b   :  { %v1572_v57 = vpop.f32.mrb[44].mxu0  ;;  %v1613_v6 = vpop.f32.mrb[44].mxu1 }
 0x87c   :  { %v1620_v16 = vadd.f32 %v1572_v57, %v3016_v14  ;;  %v1622_v17 = vadd.f32 %v1613_v6, %v3017_v18  ;;  %v1574_v0 = vpop.f32.mrb[45].mxu0  ;;  %v1615_v19 = vpop.f32.mrb[45].mxu1 }
 0x87d   :  { %v1621_v21 = vadd.f32 %v1574_v0, %v3018_v20  ;;  %v1623_v27 = vadd.f32 %v1615_v19, %v3019_v30  ;;  %v1576_v9 = vpop.f32.mrb[46].mxu0  ;;  %v1617_v24 = vpop.f32.mrb[46].mxu1 }
 0x87e   :  { %v1879_v26 = vmul.f32 -1.442695, %v1620_v16  ;;  %v1577_v28 = vpop.f32.mrb[47].mxu0  ;;  %v1618_v53 = vpop.f32.mrb[47].mxu1  ;;  %v1881_v34 = vmul.f32 -1.442695, %v1622_v17 }
 0x87f   :  { %v1880_v33 = vmul.f32 -1.442695, %v1621_v21 }
 0x880   :  { %2153 = vpow2.f32 %v1879_v26 }
 0x881   :  { %2155 = vpow2.f32 %v1880_v33 }
 0x882   :  { %2157 = vtanh.f32 %v1623_v27 }
 0x883   :  { %2159 = vpow2.f32 %v1881_v34 }
 0x88a   :  { %v2154_v32 = vpop.eup %2153 }
 0x88b   :  { %v1633_v44 = vadd.f32 1.0, %v2154_v32  ;;  %v2156_v62 = vpop.eup %2155 }
 0x88c   :  { %v1634_v29 = vadd.f32 1.0, %v2156_v62  ;;  %v2158_v25 = vpop.eup %2157 }
 0x88d   :  { %2161 = vrcp.f32 %v1633_v44  ;;  %v2160_v11 = vpop.eup %2159 }
 0x88e   :  { %2163 = vrcp.f32 %v1634_v29  ;;  %v1635_v8 = vadd.f32 1.0, %v2160_v11 }
 0x890   :  { %2165 = vrcp.f32 %v1635_v8 }
 0x897   :  { %v2162_v22 = vpop.eup %2161 }
 0x898   :  { %v1644_v35 = vmul.f32 %v2162_v22, %v2158_v25  ;;  %v2164_v13 = vpop.eup %2163 }
 0x899   :  { %v1643_v12 = vmul.f32 %v2164_v13, %v2945_v3 }
 0x89a   :  { %v2166_v23 = vpop.eup %2165 }
 0x89b   :  { %v1645_v7 = vadd.f32 %v1644_v35, %v1643_v12 }
 0x89d   :  { %2167 = vtanh.f32 %v1645_v7 }
 0x8a7   :  { %v2168_v10 = vpop.eup %2167 }
 0x8a8   :  { %v1647_v31 = vmul.f32 %v2168_v10, %v2166_v23 }
 0x8aa   :  { %v1653_v15 = vpack.c.bf16 %v1647_v31, %v1647_v31 }
 0x8ac   :  { %1917 = vmatmul.mubr.bf16.vlgmr.msra.gmra.mrb[48].mxu0 %v1653_v15 }
 0x97f   :  { %v1759_v39 = vpop.f32.mrb[48].mxu0 }
 0x980   :  { %v1760_v40 = vadd.f32 %v1882_v38, %v1759_v39  ;;  %v1918_v41 = vpop.f32.mrb[49].mxu0 }
 0x981   :  { %v1762_v58 = vpop.f32.mrb[50].mxu0 }
 0x982   :  { %1765 = vst [vmem:[#allocation13] sm:$0xff] %v1760_v40  ;;  %v1919_v59 = vpop.f32.mrb[51].mxu0 }
 0x983   :  { %2300 = shalt.err (!%p2297_p8)
}
 0x984   :  { %s2301_s5 = scalar_lea.hbm %s2974_s6, 128 }
 0x985   :  { %p2302_p9 = scmp.ne.s32.totalorder %s2974_s6, %s2301_s5  ;;  %p2305_p10 = scmp.lt.u32.totalorder %s2301_s5, %s2974_s6 }
 0x987   :  { %p2307_p11 = pnand %p2305_p10, %p2302_p9 }
 0x989   :  { %2310 = shalt.err (!%p2307_p11)
}
 0x98a   :  { %1775 = dma.vmem_to_hbm [thread:$0]  %s1773_s24, 128, %s2974_s6, [#allocation7]  }
 0x98b   :  { %2317 = dma.done.wait [#allocation7], 128  }
 0x98c   :  { %2318 = vsyncadd [#allocation7], 4294967168 }
 0x98d   :  { %1779 = vsyncpa [#allocation6], 1 }
 0x98e   :  { %1780 = vsyncpa [#allocation9], 1 }
 0x98f   :  { %1781 = vsyncpa [#allocation12], 1 }
 0x990   :  { %1782 = vsyncpa [#allocation7], 1 }

</bundles_post_ra>
